<compile_context>
chip_gen: v6e
topology: v6e:2x2x1
jax: 0.10.0
libtpu: 0.0.40
codegen_flags: <defaults>
</compile_context>

<pallas_src>
import numpy as np

import jax
import jax.numpy as jnp
from jax.experimental import pallas as pl
from jax.experimental.pallas import tpu as pltpu


# ----------------------------------------------------------------------------
# Kernels
# ----------------------------------------------------------------------------
def _fuse_affine_kernel_single_k(x_ref, w_ref, b_ref, o_ref):
    # x_ref : (tm, K)   activation tile (caller dtype)
    # w_ref : (K, tn)   pre-transposed weight tile (bf16 typical)
    # b_ref : (1, tn)   bias tile
    # o_ref : (tm, tn)  output tile
    x = x_ref[...].astype(w_ref.dtype)             # per-tile cast in VMEM (free under DMA)
    acc = jnp.dot(x, w_ref[...], preferred_element_type=jnp.float32)
    o_ref[...] = (acc + b_ref[...].astype(jnp.float32)).astype(o_ref.dtype)


def _fuse_affine_kernel_multi_k(x_ref, w_ref, b_ref, o_ref, acc_ref):
    # Same as above, but K is split; acc_ref (tm, tn) f32 persists across K steps.
    k = pl.program_id(2)

    @pl.when(k == 0)
    def _init():
        acc_ref[...] = jnp.zeros_like(acc_ref)

    x = x_ref[...].astype(w_ref.dtype)
    acc_ref[...] += jnp.dot(x, w_ref[...], preferred_element_type=jnp.float32)

    @pl.when(k == pl.num_programs(2) - 1)
    def _finalize():
        o_ref[...] = (acc_ref[...] + b_ref[...].astype(jnp.float32)).astype(o_ref.dtype)


# ----------------------------------------------------------------------------
# Tiling helpers
# ----------------------------------------------------------------------------
_TK_MAX = 2048


def _pick_k_tiling(indim):
    """Return (tk, padded_k).  Un-split K when it fits; otherwise an evenly
    dividing 256-multiple; otherwise zero-pad K (zeros add nothing)."""
    if indim <= _TK_MAX:
        return indim, indim
    for cand in (2048, 1024, 512, 256):
        if indim % cand == 0:
            return cand, indim
    padded = ((indim + 511) // 512) * 512
    return 512, padded


def _nbytes(shape, dtype):
    return int(np.prod(shape)) * int(np.dtype(dtype).itemsize)


# ----------------------------------------------------------------------------
# Wrapper
# ----------------------------------------------------------------------------
def fuse_layer_affine(x, weight_t, bias, indim, hidden_sz, *,
                      tm_max=512, tn_max=1024, tiny_batch_xla=False):
    """FuseLayerAffine forward.

    x        : (B, ...) whose trailing dims flatten to `indim`
    weight_t : (indim, hidden_sz)  pre-transposed nn.Linear weight (= W.T),
               typically stored bf16 (compute dtype follows the weight dtype,
               accumulation is always f32)
    bias     : (hidden_sz,)
    """
    B = x.shape[0]
    x2d = x.reshape(B, -1)                         # x.view(B, -1)

    if indim == hidden_sz:                         # reduce == False: identity
        return x2d

    assert x2d.shape[1] == indim, "flattened feature dim must equal indim"
    assert weight_t.shape == (indim, hidden_sz), "weight must be pre-transposed (indim, hidden_sz)"
    out_dtype = x2d.dtype

    if tiny_batch_xla and B <= 16:
        # Small-problem dispatch: a plain XLA matmul beats the pallas_call fixed cost.
        y = jnp.dot(x2d.astype(weight_t.dtype), weight_t, preferred_element_type=jnp.float32)
        return (y + bias.astype(jnp.float32)).astype(out_dtype)

    # ---- tile selection -----------------------------------------------------
    tk, padded_k = _pick_k_tiling(indim)
    if padded_k != indim:
        x2d = jnp.pad(x2d, ((0, 0), (0, padded_k - indim)))
        weight_t = jnp.pad(weight_t, ((0, padded_k - indim), (0, 0)))

    tm = B if B <= tm_max else tm_max              # full batch if small, else 512
    tn = hidden_sz if hidden_sz <= tn_max else tn_max
    mt = pl.cdiv(B, tm)
    nt = pl.cdiv(hidden_sz, tn)
    kt = pl.cdiv(padded_k, tk)

    # v7x megacore: keep at least 2 parallel tiles so both TensorCores get work.
    if mt == 1 and nt == 1 and hidden_sz >= 256 and hidden_sz % 256 == 0:
        tn = hidden_sz // 2
        nt = 2

    b2d = bias.reshape(1, hidden_sz)

    # ---- grid order: stream the larger operand from HBM exactly once --------
    x_bytes = _nbytes(x2d.shape, x2d.dtype)
    w_bytes = _nbytes(weight_t.shape, weight_t.dtype)
    n_outer = w_bytes >= x_bytes                   # small-batch case: weight is the big one

    if kt == 1:
        kernel = _fuse_affine_kernel_single_k
        scratch = []
        dims = ("parallel", "parallel")
        if n_outer:
            grid = (nt, mt)
            x_map = lambda j, i: (i, 0)
            w_map = lambda j, i: (0, j)
            b_map = lambda j, i: (0, j)
            o_map = lambda j, i: (i, j)
        else:
            grid = (mt, nt)
            x_map = lambda i, j: (i, 0)
            w_map = lambda i, j: (0, j)
            b_map = lambda i, j: (0, j)
            o_map = lambda i, j: (i, j)
    else:
        kernel = _fuse_affine_kernel_multi_k
        scratch = [pltpu.VMEM((tm, tn), jnp.float32)]
        dims = ("parallel", "parallel", "arbitrary")
        if n_outer:
            grid = (nt, mt, kt)
            x_map = lambda j, i, k: (i, k)
            w_map = lambda j, i, k: (k, j)
            b_map = lambda j, i, k: (0, j)
            o_map = lambda j, i, k: (i, j)
        else:
            grid = (mt, nt, kt)
            x_map = lambda i, j, k: (i, k)
            w_map = lambda i, j, k: (k, j)
            b_map = lambda i, j, k: (0, j)
            o_map = lambda i, j, k: (i, j)

    # ---- VMEM budget: real double-buffered footprint + margin, <= 48 MiB ----
    footprint = (
        2 * _nbytes((tm, tk), x2d.dtype)
        + 2 * _nbytes((tk, tn), weight_t.dtype)
        + 2 * _nbytes((1, tn), b2d.dtype)
        + 2 * _nbytes((tm, tn), out_dtype)
        + (_nbytes((tm, tn), jnp.float32) if kt > 1 else 0)
    )
    vmem_limit = int(min(48 * 2**20, max(footprint + 8 * 2**20, 16 * 2**20)))

    out = pl.pallas_call(
        kernel,
        out_shape=jax.ShapeDtypeStruct((B, hidden_sz), out_dtype),
        grid=grid,
        in_specs=[
            pl.BlockSpec((tm, tk), x_map),          # activations
            pl.BlockSpec((tk, tn), w_map),          # pre-transposed weight
            pl.BlockSpec((1, tn), b_map),           # bias
        ],
        out_specs=pl.BlockSpec((tm, tn), o_map),
        scratch_shapes=scratch,
        compiler_params=pltpu.CompilerParams(
            dimension_semantics=dims,
            vmem_limit_bytes=vmem_limit,
        ),
    )(x2d, weight_t, b2d)
    return out


# ----------------------------------------------------------------------------
# Parameter init (FuseLayerAffine.init_weights), pre-transposed + bf16 storage
# ----------------------------------------------------------------------------
def init_fuse_params(key, indim, hidden_sz, *, param_dtype=jnp.bfloat16):
    """Re-implementation of FuseLayerAffine.init_weights.

    Returns the weight already transposed to (indim, hidden_sz) = W.T and cast
    to `param_dtype` (bf16 by default: native MXU dtype, half the HBM traffic).
    The transpose/cast happen once at parameter time, never per call.
    """
    if hidden_sz % indim != 0:
        raise RuntimeError("Not mod!")
    base = np.kron(np.ones((hidden_sz // indim, 1)), np.eye(indim))   # (hidden_sz, indim)
    noise = 0.01 * jax.random.normal(key, (hidden_sz, indim), dtype=jnp.float32)
    w_torch = jnp.asarray(base, dtype=jnp.float32) + noise            # torch Linear layout
    weight_t = w_torch.T.astype(param_dtype)                          # (indim, hidden_sz)
    bias = jnp.zeros((hidden_sz,), dtype=jnp.float32)
    return weight_t, bias


# ----------------------------------------------------------------------------
# Self-test
# ----------------------------------------------------------------------------
if __name__ == "__main__":
    # Small shapes: input (2, 4, 16, 16) flattens to indim = 1024, hidden_sz = 2048.
    B, C, H, W = 2, 4, 16, 16
    indim = C * H * W            # 1024
    hidden_sz = 2 * indim        # 2048

    key = jax.random.PRNGKey(0)
    kx, kw, kb = jax.random.split(key, 3)

    x = jax.random.normal(kx, (B, C, H, W), dtype=jnp.float32)
    weight_t, bias = init_fuse_params(kw, indim, hidden_sz)                        # bf16 params
    weight_t_f32, _ = init_fuse_params(kw, indim, hidden_sz, param_dtype=jnp.float32)

    out = fuse_layer_affine(x, weight_t, bias, indim, hidden_sz)
    out = jax.block_until_ready(out)
    assert out.shape == (B, hidden_sz)

    x2d = x.reshape(B, -1)

    # Tight check vs a reference using the same bf16-rounded operands
    # (products of bf16 values are exact in f32; only summation order differs).
    ref_bf16 = (x2d.astype(jnp.bfloat16).astype(jnp.float32)
                @ weight_t.astype(jnp.float32)) + bias
    assert jnp.allclose(out, ref_bf16, atol=1e-3, rtol=1e-3)

    # Looser check vs the full-f32 PyTorch semantics (x.view(B,-1) @ W.T + b);
    # bf16 weight/activation storage shifts results by ~O(1e-3).
    ref_f32 = x2d @ weight_t_f32.astype(jnp.float32) + bias
    assert jnp.allclose(out, ref_f32, atol=5e-2, rtol=5e-2)

    # Exercise a non-zero bias (module init is zero, but forward supports any bias).
    bias2 = 0.1 * jax.random.normal(kb, (hidden_sz,), dtype=jnp.float32)
    out2 = jax.block_until_ready(fuse_layer_affine(x, weight_t, bias2, indim, hidden_sz))
    assert jnp.allclose(out2, ref_bf16 + bias2, atol=1e-3, rtol=1e-3)

    # Identity path (indim == hidden_sz -> reduce == False).
    out_id = fuse_layer_affine(x, weight_t, bias, indim, indim)
    assert jnp.allclose(out_id, x2d)

    # TODO(synk): for truly latency-critical tiny batches, call with
    # tiny_batch_xla=True to skip the kernel fixed cost entirely.
    print("KERNEL_OK")
</pallas_src>

<mosaic_0001>
module attributes {stable_mosaic.version = 11 : i64} {
  func.func @_fuse_affine_kernel_single_k(%arg0: i32, %arg1: i32, %arg2: memref<2x1024xf32, #tpu.memory_space<vmem>>, %arg3: memref<1024x1024xbf16, #tpu.memory_space<vmem>>, %arg4: memref<1x1024xf32, #tpu.memory_space<vmem>>, %arg5: memref<2x1024xf32, #tpu.memory_space<vmem>>) attributes {dimension_semantics = [#tpu.dimension_semantics<parallel>, #tpu.dimension_semantics<parallel>], iteration_bounds = array<i64: 2, 1>, scalar_prefetch = 0 : i64, scratch_operands = 0 : i64, tpu.core_type = #tpu.core_type<tc>, window_params = [{transform_indices = @transform_0, window_bounds = array<i64: 2, 1024>}, {transform_indices = @transform_1, window_bounds = array<i64: 1024, 1024>}, {transform_indices = @transform_2, window_bounds = array<i64: 1, 1024>}, {transform_indices = @transform_3, window_bounds = array<i64: 2, 1024>}]} {
    %c0 = arith.constant 0 : index
    %c0_0 = arith.constant 0 : index
    %0 = vector.load %arg2[%c0, %c0_0] : memref<2x1024xf32, #tpu.memory_space<vmem>>, vector<2x1024xf32>
    %1 = arith.truncf %0 : vector<2x1024xf32> to vector<2x1024xbf16>
    %c0_1 = arith.constant 0 : index
    %c0_2 = arith.constant 0 : index
    %2 = vector.load %arg3[%c0_1, %c0_2] : memref<1024x1024xbf16, #tpu.memory_space<vmem>>, vector<1024x1024xbf16>
    %cst = arith.constant dense<0.000000e+00> : vector<2x1024xf32>
    %3 = tpu.matmul %1, %2, %cst {dimension_numbers = #tpu.dot_dimension_numbers<[1], [0], [0], [1], [0, 0, 1, 1], [], []>} : vector<2x1024xbf16>, vector<1024x1024xbf16>, vector<2x1024xf32> -> vector<2x1024xf32>
    %c0_3 = arith.constant 0 : index
    %c0_4 = arith.constant 0 : index
    %4 = vector.load %arg4[%c0_3, %c0_4] : memref<1x1024xf32, #tpu.memory_space<vmem>>, vector<1x1024xf32>
    %5 = vector.broadcast %4 : vector<1x1024xf32> to vector<2x1024xf32>
    %6 = arith.addf %3, %5 : vector<2x1024xf32>
    %c0_5 = arith.constant 0 : index
    %c0_6 = arith.constant 0 : index
    %7 = vector.load %arg5[%c0_5, %c0_6] : memref<2x1024xf32, #tpu.memory_space<vmem>>, vector<2x1024xf32>
    tpu.vector_store %arg5[%c0_5, %c0_6], %6 {strides = array<i32>} : memref<2x1024xf32, #tpu.memory_space<vmem>>, vector<2x1024xf32>,
    return
  }
  func.func @transform_0(%arg0: i32, %arg1: i32) -> (i32, i32) {
    %c0_i32 = arith.constant 0 : i32
    %c0_i32_0 = arith.constant 0 : i32
    return %arg1, %c0_i32 : i32, i32
  }
  func.func @transform_1(%arg0: i32, %arg1: i32) -> (i32, i32) {
    %c0_i32 = arith.constant 0 : i32
    %c0_i32_0 = arith.constant 0 : i32
    return %c0_i32, %arg0 : i32, i32
  }
  func.func @transform_2(%arg0: i32, %arg1: i32) -> (i32, i32) {
    %c0_i32 = arith.constant 0 : i32
    %c0_i32_0 = arith.constant 0 : i32
    return %c0_i32, %arg0 : i32, i32
  }
  func.func @transform_3(%arg0: i32, %arg1: i32) -> (i32, i32) {
    %c0_i32 = arith.constant 0 : i32
    return %arg1, %arg0 : i32, i32
  }
}

</mosaic_0001>

<bundles_post_ra>
// kernel: tpu_custom_call.1
= control target key start
LH: loop header
LB: loop body
LE: loop exit
PB: predicated region body
PF: predicated region fallthrough
CT: control target
= control target key end

     0   :  { %s5923_s0 = inlined_call_operand.hbm [shape: f32[2,1024], index: 0, kind: input, shape index: {}]   ;;  %s5924_s1 = inlined_call_operand.hbm [shape: bf16[1024,2048], index: 1, kind: input, shape index: {}]   ;;  %s5925_s2 = inlined_call_operand.hbm [shape: f32[1,2048], index: 2, kind: input, shape index: {}]   ;;  %s5926_s3 = inlined_call_operand.hbm [shape: f32[2,2048], index: 3, kind: output, shape index: {}]  }
   0x1   :  { %5930 = sst [smem:[#allocation12_spill]] %s5924_s1 }
   0x2   :  { %8 = vsyncpa [#allocation3], 0 }
   0x3   :  { %9 = vsyncpa [#allocation6], 0 }
   0x4   :  { %11 = vsyncpa [#allocation6 + $0x1], 0 }
   0x5   :  { %12 = vsyncpa [#allocation4], 0 }
   0x6   :  { %14 = vsyncpa [#allocation4 + $0x1], 0  ;;  %s5081_s12 = smov 0   ;;  %s5083_s13 = smov 0  }
   0x7   :  { %s5085_s14 = smov 0   ;;  %s5087_s15 = smov 0  }
   0x8   :  { %s5089_s16 = smov 0   ;;  %s5091_s17 = smov 0  }
   0x9 LB: > { %s32_s18 = sadd.s32 1, %s5047_s16  ;;  %s65_s19 = sadd.s32 1, %s5039_s14  ;;  %s5051_s17 = sphi %s5091_s17, %s20_s17   ;;  %s5047_s16 = sphi %s5089_s16, %s5948_s16   ;;  %s5043_s15 = sphi %s5087_s15, %s5947_s15   ;;  %s5039_s14 = sphi %s5085_s14, %s5946_s14   ;;  %s5035_s13 = sphi %s5083_s13, %s5945_s13   ;;  %s5031_s12 = sphi %s5081_s12, %s5944_s12  }
   0xa   : > { %p34_p0 = scmp.ge.s32.totalorder %s32_s18, 2  ;;  %p72_p1 = scmp.ne.s32.totalorder %s5039_s14, %s5035_s13 }
   0xb   : > { %p73_p2 = scmp.eq.s32.totalorder %s5051_s17, 0  ;;  %p4826_p5 = scmp.lt.s32.totalorder %s5051_s17, 2 }
   0xc   : > { %s5950_s18 = smov (%p34_p0, %s32_s18), 0  ;;  %s170_s21 = sand.u32 1, %s5051_s17  }
   0xd   : > { %p74_p4 = por %p73_p2, %p72_p1  ;;  %s62_s20 = ssub.s32 %s5047_s16, %s5950_s18 }
   0xe   : > { %p63_p6 = scmp.eq.s32.totalorder %s62_s20, 0  ;;  %s172_s22 = sand.u32 1, %s5039_s14  }
   0xf   : > { %s4797_s23 = sshll.u32 %s5047_s16, 9  ;;  %s4269_s25 = sshll.u32 %s172_s22, 12 }
  0x10   : > { %s5129_s24 = scalar_select %p63_p6, %s5039_s14, %s65_s19  }
  0x11   : > { %s5931_s1 = sld [smem:[#allocation12_spill]]  ;;  %p5136_p7 = pnand %p4826_p5, %p74_p4 }
  0x12   : > { %s174_s30 = scalar_lea.vmem [#allocation5], %s4269_s25  ;;  %s5140_s5 = scalar_lea.sflag [#allocation6], %s170_s21 }
  0x13   : > { %s181_s4 = sshll.u32 %s174_s30, 4  ;;  %p4887_p8 = pneg %p5136_p7  ;;  %s182_s4 = int_to_ptr.vmem [resolvable:$true] %s181_s4 }
  0x14   : > { %s4898_s6 = scalar_lea.vmem %s182_s4, 65536  ;;  %s5053_s7 = smov [#allocation5]  }
  0x15   : > { %p4899_p9 = scmp.ne.s32.totalorder %s182_s4, %s4898_s6  ;;  %s4903_s8 = sshll.u32 %s5053_s7, 4  ;;  %s4904_s8 = int_to_ptr.vmem [resolvable:$false] %s4903_s8 }
  0x16   : > { %s4905_s9 = scalar_lea.vmem %s4904_s8, 131072  ;;  %p4906_p12 = scmp.lt.s32.totalorder %s182_s4, %s4904_s8 }
  0x17   : > { %s180_s28 = scalar_lea.hbm %s5931_s1, %s4797_s23  ;;  %p4901_p10 = pnand %p4899_p9, %p4887_p8 }
  0x18   : > { %p4907_p13 = scmp.lt.s32.totalorder %s4905_s9, %s4898_s6 }
  0x19   : > { %p4902_p11 = pneg %p4901_p10 }
  0x1a   : > { %p4908_p0 = por %p4907_p13, %p4906_p12 }
  0x1c   : > { %p4909_p2 = pnand %p4908_p0, %p4902_p11 }
  0x1e   : > { %4912 = shalt.err (!%p4909_p2)
}
  0x1f   : > { %s5054_s10 = smov 1024   ;;  %s5055_s11 = smov 512  }
  0x20   : > { %s5056_s19 = smov 32   ;;  %s5151_s20 = sadd.s32 4294967295, %s5051_s17  }
  0x21   : > { %4817 = dma.hbm_to_vmem [thread:$0]  (!%p5136_p7), %s180_s28, 65536, %s182_s4, %s5140_s5, %s5054_s10, %s5055_s11, %s5056_s19  }
  0x22   : > { %s4265_s21 = sadd.s32 4294967294, %s5051_s17   ;;  %p78_p4 = scmp.ne.s32.totalorder %s5035_s13, %s5031_s12 }
  0x23   : > { %p5928_p5 = scmp.eq.s32.totalorder %s5151_s20, 0  ;;  %p130_p6 = scmp.eq.s32.totalorder %s5151_s20, 1 }
  0x24   : > { %p136_p9 = scmp.eq.s32.totalorder %s4265_s21, 1  ;;  %p4266_p11 = scmp.ge.s32.totalorder %s5051_s17, 1 }
  0x25   : > { %p5160_p10 = por %p5928_p5, %p78_p4  ;;  %p5168_p12 = por %p130_p6, %p72_p1 }
  0x26   : > { %p5172_p13 = por %p136_p9, %p78_p4  ;;  %p143_p0 = scmp.lt.s32.totalorder %s5051_s17, 3 }
  0x27   : > { %s5933_s23 = scalar_select %p5160_p10, 1, 0 }
  0x28   : > { %s5934_s25 = scalar_select %p5168_p12, 1, 0 }
  0x29   : > { %s5935_s26 = scalar_select %p5172_p13, 1, 0 }
  0x2a   : > { %s4272_s27 = sshll.u32 %s172_s22, 3  ;;  %p5179_p2 = pnand %p4266_p11, %p143_p0 }
  0x2b   : > { %s5057_s30 = smov [#allocation2]   ;;  %s4798_s6 = sshll.u32 %s5047_s16, 7 }
  0x2c   : > { %s159_s4 = sshll.u32 %s5057_s30, 4  ;;  %p4810_p1 = pneg %p5179_p2  ;;  %s5183_s4 = int_to_ptr.vmem [resolvable:$true] %s159_s4 }
  0x2d   : > { %s201_s9 = scalar_lea.hbm %s5925_s2, %s4798_s6  ;;  %s195_s10 = scalar_lea.vmem [#allocation7], %s4272_s27 }
  0x2e   : > { %s203_s11 = sshll.u32 %s195_s10, 4  ;;  %p5193_p4 = pnand %p4810_p1, %p5928_p5  ;;  %s204_s11 = int_to_ptr.vmem [resolvable:$true] %s203_s11 }
  0x2f   : > { %s4926_s19 = scalar_lea.vmem %s204_s11, 128  ;;  %s5058_s21 = smov [#allocation7]  }
  0x30   : > { %p4927_p6 = scmp.ne.s32.totalorder %s204_s11, %s4926_s19  ;;  %s4931_s30 = sshll.u32 %s5058_s21, 4  ;;  %s4932_s30 = int_to_ptr.vmem [resolvable:$false] %s4931_s30 }
  0x31   : > { %s4933_s1 = scalar_lea.vmem %s4932_s30, 256  ;;  %p4934_p0 = scmp.lt.s32.totalorder %s204_s11, %s4932_s30 }
  0x32   : > { %p4929_p9 = pnand %p4927_p6, %p4887_p8  ;;  %p4935_p3 = scmp.lt.s32.totalorder %s4933_s1, %s4926_s19 }
  0x34   : > { %p4930_p11 = pneg %p4929_p9  ;;  %p4936_p13 = por %p4935_p3, %p4934_p0 }
  0x36   : > { %p4937_p12 = pnand %p4936_p13, %p4930_p11 }
  0x38   : > { %4940 = shalt.err (!%p4937_p12)
}
  0x39   : > { %4820 = dma.hbm_to_vmem [thread:$0]  (!%p5136_p7), %s201_s9, 128, %s204_s11, %s5140_s5  }
  0x3a   : > { %p4943_p8 = pneg %p5193_p4  ;;  %s4952_s27 = scalar_lea.vmem %s5183_s4, 256 }
  0x3b   : > { %p4953_p1 = scmp.ne.s32.totalorder %s5183_s4, %s4952_s27  ;;  %p4960_p5 = scmp.lt.s32.totalorder %s5183_s4, %s5183_s4 }
  0x3c   : > { %p4961_p10 = scmp.lt.s32.totalorder %s4952_s27, %s4952_s27 }
  0x3d   : > { %p4955_p6 = pnand %p4953_p1, %p4943_p8 }
  0x3e   : > { %p4962_p3 = por %p4961_p10, %p4960_p5 }
  0x3f   : > { %p4956_p9 = pneg %p4955_p6 }
  0x41   : > { %p4963_p13 = pnand %p4962_p3, %p4956_p9 }
  0x43   : > { %4966 = shalt.err (!%p4963_p13)
}
  0x44   : > { %4813 = dma.hbm_to_vmem [thread:$0]  (!%p5193_p4), %s5923_s0, 256, %s5183_s4, [#allocation3]  }
  0x45   : > { %212 = sbr.rel (%p5179_p2) target bundleno = 814 (0x32e), region = 32  ;;  %p5938_p7 = scmp.eq.s32.totalorder (!%p5179_p2), %s5151_s20, 0 }
  0x4a   : > { %5018 = dma.done.wait (%p5938_p7), [#allocation3], 256   ;;  %p5939_p12 = pmov %p5938_p7 }
  0x4b   : > { %s218_s5 = sand.u32 1, %s5151_s20   ;;  %s5223_s6 = sand.u32 1, %s5035_s13  }
  0x4c   : > { %5020 = vsyncadd (%p5939_p12), [#allocation3], 4294967040  ;;  %s4277_s7 = sshll.u32 %s5223_s6, 12  ;;  %s219_s8 = scalar_lea.sflag [#allocation6], %s218_s5 }
  0x4d   : > { %s5226_s9 = scalar_lea.vmem [#allocation5], %s4277_s7  ;;  %p5940_p5 = scmp.ne.s32.totalorder %s5933_s23, 0 }
  0x4f   : > { %5022 = dma.done.wait (%p5940_p5), %s219_s8, 65664  }
  0x50   : > { %5024 = vsyncadd (%p5940_p5), %s219_s8, 4294901632  ;;  %v372_v0 = vld [vmem:[%s5226_s9 + $0x1c0] sm:$0xff]  ;;  %v5059_v32 = vmov 1983009808   ;;  %v270_v34 = vlaneseq  ;;  %v262_v59 = vld [vmem:[#allocation2] sm:$0xff]  ;;  %s4278_s20 = sshll.u32 %s5223_s6, 3 }
  0x51   : > { %v376_v1 = vld [vmem:[%s5226_s9 + $0x1e0] sm:$0xff]  ;;  %v268_v33 = vunpack.c.l.s4 %v5059_v32  ;;  %s5557_s23 = scalar_lea.vmem [#allocation7], %s4278_s20  ;;  %s4279_s28 = sshll.u32 %s5223_s6, 4 }
  0x52   : > { %v500_v2 = vld [vmem:[%s5226_s9 + $0x5c0] sm:$0xff]  ;;  %v4337_v3 = vcombine.high %v372_v0, %v376_v1  ;;  %v4336_v5 = vcombine.low %v372_v0, %v376_v1  ;;  %v5254_v44 = vshrl.u32 %v270_v34, 7  ;;  %v266_v0 = vcombine.high %v262_v59, %v262_v59  ;;  %s5826_s4 = scalar_lea.vmem [#allocation8], %s4279_s28  ;;  %s4799_s10 = sshll.u32 %s5043_s15, 8 }
  0x53   : > { %v504_v4 = vld [vmem:[%s5226_s9 + $0x5e0] sm:$0xff]  ;;  %v269_v43 = vunpack.c.0.s8 %v268_v33  ;;  %s4149_s11 = sshll.u32 %s5826_s4, 4  ;;  %s4147_s21 = scalar_lea.hbm %s5926_s3, %s4799_s10  ;;  %s4150_s11 = int_to_ptr.vmem [resolvable:$true] %s4149_s11 }
  0x54   : > { %v364_v6 = vld [vmem:[%s5226_s9 + $0x180] sm:$0xff]  ;;  %v4465_v8 = vcombine.high %v500_v2, %v504_v4  ;;  %v4464_v9 = vcombine.low %v500_v2, %v504_v4  ;;  %3430 = vmatprep.subr.bf16.mxu0 %v4337_v3  ;;  %s4133_s30 = scalar_lea.sflag [#allocation4], %s5223_s6  ;;  %s4967_s27 = scalar_lea.vmem %s4150_s11, 256 }
  0x55   : > { %v368_v7 = vld [vmem:[%s5226_s9 + $0x1a0] sm:$0xff]  ;;  %3431 = vmatpush1.bf16.msra.mxu0 %v4336_v5  ;;  %v5261_v53 = vsub.s32 %v269_v43, %v5254_v44  ;;  %p4968_p10 = scmp.ne.s32.totalorder %s4150_s11, %s4967_s27  ;;  %p5941_p2 = scmp.ne.s32.totalorder %s5934_s25, 0 }
  0x56   : > { %v4329_v10 = vcombine.high %v364_v6, %v368_v7  ;;  %v492_v11 = vld [vmem:[%s5226_s9 + $0x580] sm:$0xff]  ;;  %3471 = vmatprep.subr.bf16.mxu1 %v4465_v8  ;;  %v4328_v18 = vcombine.low %v364_v6, %v368_v7  ;;  %s5060_s1 = smov [#allocation8]  }
  0x57   : > { %v496_v12 = vld [vmem:[%s5226_s9 + $0x5a0] sm:$0xff]  ;;  %3472 = vmatpush1.bf16.msra.mxu1 %v4464_v9  ;;  %v5268_v63 = vrot.slane %v262_v59, %v5261_v53  ;;  %v5275_v5 = vrot.slane %v266_v0, %v5261_v53  ;;  %p4969_p4 = pnand %p4968_p10, %p5941_p2  ;;  %s4971_s15 = sshll.u32 %s5060_s1, 4  ;;  %s4972_s15 = int_to_ptr.vmem [resolvable:$false] %s4971_s15 }
  0x58   : > { %v356_v13 = vld [vmem:[%s5226_s9 + $0x140] sm:$0xff]  ;;  %v4457_v14 = vcombine.high %v492_v11, %v496_v12  ;;  %3432 = vmatprep.subr.bf16.mxu0 %v4329_v10  ;;  %v4456_v19 = vcombine.low %v492_v11, %v496_v12  ;;  %s4973_s29 = scalar_lea.vmem %s4972_s15, 512  ;;  %p4974_p0 = scmp.lt.s32.totalorder %s4150_s11, %s4972_s15 }
  0x59   : > { %v360_v15 = vld [vmem:[%s5226_s9 + $0x160] sm:$0xff]  ;;  %3433 = vmatpush1.bf16.msra.mxu0 %v4328_v18  ;;  %v281_v4 = vcombine.high %v5268_v63, %v5268_v63  ;;  %v282_v12 = vcombine.high %v5275_v5, %v5275_v5  ;;  %p4970_p11 = pneg %p4969_p4  ;;  %p4975_p8 = scmp.lt.s32.totalorder %s4973_s29, %s4967_s27 }
  0x5a   : > { %v484_v16 = vld [vmem:[%s5226_s9 + $0x540] sm:$0xff]  ;;  %v4321_v20 = vcombine.high %v356_v13, %v360_v15  ;;  %3473 = vmatprep.subr.bf16.mxu1 %v4457_v14  ;;  %v4320_v26 = vcombine.low %v356_v13, %v360_v15 }
  0x5b   : > { %v488_v17 = vld [vmem:[%s5226_s9 + $0x560] sm:$0xff]  ;;  %3474 = vmatpush1.bf16.msra.mxu1 %v4456_v19  ;;  %v5279_v11 = vpack.c.bf16 %v281_v4, %v281_v4  ;;  %v263_v4 = vld [vmem:[#allocation2 + $0x8] sm:$0xff]  ;;  %p4976_p1 = por %p4975_p8, %p4974_p0 }
  0x5c   : > { %v4449_v21 = vcombine.high %v484_v16, %v488_v17  ;;  %v348_v22 = vld [vmem:[%s5226_s9 + $0x100] sm:$0xff]  ;;  %3434 = vmatprep.subr.bf16.mxu0 %v4321_v20  ;;  %v4448_v27 = vcombine.low %v484_v16, %v488_v17  ;;  %v5286_v16 = vpack.c.bf16 %v282_v12, %v282_v12 }
  0x5d   : > { %v352_v23 = vld [vmem:[%s5226_s9 + $0x120] sm:$0xff]  ;;  %3435 = vmatpush1.bf16.msra.mxu0 %v4320_v26  ;;  %3462 = vmatprep.mubr.bf16.mxu0 %v5279_v11  ;;  %p4977_p6 = pnand %p4976_p1, %p4970_p11 }
  0x5e   : > { %v476_v24 = vld [vmem:[%s5226_s9 + $0x500] sm:$0xff]  ;;  %v4313_v28 = vcombine.high %v348_v22, %v352_v23  ;;  %3475 = vmatprep.subr.bf16.mxu1 %v4449_v21  ;;  %v4312_v37 = vcombine.low %v348_v22, %v352_v23  ;;  %3503 = vmatprep.mubr.bf16.mxu1 %v5286_v16 }
  0x5f   : > { %v480_v25 = vld [vmem:[%s5226_s9 + $0x520] sm:$0xff]  ;;  %3476 = vmatpush1.bf16.msra.mxu1 %v4448_v27 }
  0x60   : > { %v4441_v29 = vcombine.high %v476_v24, %v480_v25  ;;  %v340_v30 = vld [vmem:[%s5226_s9 + $0xc0] sm:$0xff]  ;;  %3436 = vmatprep.subr.bf16.mxu0 %v4313_v28  ;;  %v4440_v38 = vcombine.low %v476_v24, %v480_v25 }
  0x61   : > { %v344_v31 = vld [vmem:[%s5226_s9 + $0xe0] sm:$0xff]  ;;  %3437 = vmatpush1.bf16.msra.mxu0 %v4312_v37 }
  0x62   : > { %v468_v35 = vld [vmem:[%s5226_s9 + $0x4c0] sm:$0xff]  ;;  %v4305_v39 = vcombine.high %v340_v30, %v344_v31  ;;  %3477 = vmatprep.subr.bf16.mxu1 %v4441_v29  ;;  %v4304_v47 = vcombine.low %v340_v30, %v344_v31 }
  0x63   : > { %v472_v36 = vld [vmem:[%s5226_s9 + $0x4e0] sm:$0xff]  ;;  %3478 = vmatpush1.bf16.msra.mxu1 %v4440_v38 }
  0x64   : > { %v4433_v40 = vcombine.high %v468_v35, %v472_v36  ;;  %v332_v41 = vld [vmem:[%s5226_s9 + $0x80] sm:$0xff]  ;;  %3438 = vmatprep.subr.bf16.mxu0 %v4305_v39  ;;  %v4432_v48 = vcombine.low %v468_v35, %v472_v36 }
  0x65   : > { %v336_v42 = vld [vmem:[%s5226_s9 + $0xa0] sm:$0xff]  ;;  %3439 = vmatpush1.bf16.msra.mxu0 %v4304_v47 }
  0x66   : > { %v460_v45 = vld [vmem:[%s5226_s9 + $0x480] sm:$0xff]  ;;  %v4297_v49 = vcombine.high %v332_v41, %v336_v42  ;;  %3479 = vmatprep.subr.bf16.mxu1 %v4433_v40  ;;  %v4296_v56 = vcombine.low %v332_v41, %v336_v42 }
  0x67   : > { %v464_v46 = vld [vmem:[%s5226_s9 + $0x4a0] sm:$0xff]  ;;  %3480 = vmatpush1.bf16.msra.mxu1 %v4432_v48 }
  0x68   : > { %v4425_v50 = vcombine.high %v460_v45, %v464_v46  ;;  %v324_v51 = vld [vmem:[%s5226_s9 + $0x40] sm:$0xff]  ;;  %3440 = vmatprep.subr.bf16.mxu0 %v4297_v49  ;;  %v4424_v57 = vcombine.low %v460_v45, %v464_v46 }
  0x69   : > { %v328_v52 = vld [vmem:[%s5226_s9 + $0x60] sm:$0xff]  ;;  %3441 = vmatpush1.bf16.msra.mxu0 %v4296_v56 }
  0x6a   : > { %v452_v54 = vld [vmem:[%s5226_s9 + $0x440] sm:$0xff]  ;;  %v4289_v58 = vcombine.high %v324_v51, %v328_v52  ;;  %3481 = vmatprep.subr.bf16.mxu1 %v4425_v50  ;;  %v4288_v3 = vcombine.low %v324_v51, %v328_v52 }
  0x6b   : > { %v456_v55 = vld [vmem:[%s5226_s9 + $0x460] sm:$0xff]  ;;  %3482 = vmatpush1.bf16.msra.mxu1 %v4424_v57 }
  0x6c   : > { %v4417_v60 = vcombine.high %v452_v54, %v456_v55  ;;  %v316_v61 = vld [vmem:[%s5226_s9] sm:$0xff]  ;;  %3442 = vmatprep.subr.bf16.mxu0 %v4289_v58  ;;  %v4416_v6 = vcombine.low %v452_v54, %v456_v55 }
  0x6d   : > { %v320_v62 = vld [vmem:[%s5226_s9 + $0x20] sm:$0xff]  ;;  %3443 = vmatpush1.bf16.msra.mxu0 %v4288_v3 }
  0x6e   : > { %v444_v1 = vld [vmem:[%s5226_s9 + $0x400] sm:$0xff]  ;;  %v4281_v7 = vcombine.high %v316_v61, %v320_v62  ;;  %3483 = vmatprep.subr.bf16.mxu1 %v4417_v60  ;;  %v4280_v15 = vcombine.low %v316_v61, %v320_v62 }
  0x6f   : > { %v448_v2 = vld [vmem:[%s5226_s9 + $0x420] sm:$0xff]  ;;  %3484 = vmatpush1.bf16.msra.mxu1 %v4416_v6 }
  0x70   : > { %v4409_v8 = vcombine.high %v444_v1, %v448_v2  ;;  %v436_v9 = vld [vmem:[%s5226_s9 + $0x3c0] sm:$0xff]  ;;  %3444 = vmatprep.subr.bf16.mxu0 %v4281_v7  ;;  %v4408_v17 = vcombine.low %v444_v1, %v448_v2 }
  0x71   : > { %v440_v10 = vld [vmem:[%s5226_s9 + $0x3e0] sm:$0xff]  ;;  %3445 = vmatpush1.bf16.msra.mxu0 %v4280_v15 }
  0x72   : > { %v564_v13 = vld [vmem:[%s5226_s9 + $0x7c0] sm:$0xff]  ;;  %v4401_v18 = vcombine.high %v436_v9, %v440_v10  ;;  %3485 = vmatprep.subr.bf16.mxu1 %v4409_v8  ;;  %v4400_v24 = vcombine.low %v436_v9, %v440_v10 }
  0x73   : > { %v568_v14 = vld [vmem:[%s5226_s9 + $0x7e0] sm:$0xff]  ;;  %3486 = vmatpush1.bf16.msra.mxu1 %v4408_v17 }
  0x74   : > { %v4529_v19 = vcombine.high %v564_v13, %v568_v14  ;;  %v428_v20 = vld [vmem:[%s5226_s9 + $0x380] sm:$0xff]  ;;  %3446 = vmatprep.subr.bf16.mxu0 %v4401_v18  ;;  %v4528_v25 = vcombine.low %v564_v13, %v568_v14  ;;  %v283_v14 = vcombine.high %v263_v4, %v263_v4 }
  0x75   : > { %v432_v21 = vld [vmem:[%s5226_s9 + $0x3a0] sm:$0xff]  ;;  %3447 = vmatpush2.bf16.msra.mxu0 %v4400_v24 }
  0x76   : > { %v556_v22 = vld [vmem:[%s5226_s9 + $0x780] sm:$0xff]  ;;  %v4393_v26 = vcombine.high %v428_v20, %v432_v21  ;;  %3487 = vmatprep.subr.bf16.mxu1 %v4529_v19  ;;  %v4392_v32 = vcombine.low %v428_v20, %v432_v21 }
  0x77   : > { %v560_v23 = vld [vmem:[%s5226_s9 + $0x7a0] sm:$0xff]  ;;  %3488 = vmatpush2.bf16.msra.mxu1 %v4528_v25  ;;  %v5325_v25 = vrot.slane %v283_v14, %v5261_v53 }
  0x78   : > { %v4521_v27 = vcombine.high %v556_v22, %v560_v23  ;;  %v420_v28 = vld [vmem:[%s5226_s9 + $0x340] sm:$0xff]  ;;  %3448 = vmatprep.subr.bf16.mxu0 %v4393_v26  ;;  %v4520_v33 = vcombine.low %v556_v22, %v560_v23  ;;  %v5320_v22 = vrot.slane %v263_v4, %v5261_v53 }
  0x79   : > { %v424_v29 = vld [vmem:[%s5226_s9 + $0x360] sm:$0xff]  ;;  %3449 = vmatpush2.bf16.msra.mxu0 %v4392_v32 }
  0x7a   : > { %v548_v30 = vld [vmem:[%s5226_s9 + $0x740] sm:$0xff]  ;;  %v4385_v34 = vcombine.high %v420_v28, %v424_v29  ;;  %3489 = vmatprep.subr.bf16.mxu1 %v4521_v27  ;;  %v4384_v40 = vcombine.low %v420_v28, %v424_v29  ;;  %v298_v32 = vcombine.high %v5320_v22, %v5320_v22 }
  0x7b   : > { %v552_v31 = vld [vmem:[%s5226_s9 + $0x760] sm:$0xff]  ;;  %3490 = vmatpush2.bf16.msra.mxu1 %v4520_v33  ;;  %v5333_v33 = vpack.c.bf16 %v5268_v63, %v5268_v63 }
  0x7c   : > { %v4513_v35 = vcombine.high %v548_v30, %v552_v31  ;;  %v412_v36 = vld [vmem:[%s5226_s9 + $0x300] sm:$0xff]  ;;  %3450 = vmatprep.subr.bf16.mxu0 %v4385_v34  ;;  %v4512_v41 = vcombine.low %v548_v30, %v552_v31 }
  0x7d   : > { %v416_v37 = vld [vmem:[%s5226_s9 + $0x320] sm:$0xff]  ;;  %3451 = vmatpush2.bf16.msra.mxu0 %v4384_v40 }
  0x7e   : > { %v540_v38 = vld [vmem:[%s5226_s9 + $0x700] sm:$0xff]  ;;  %v4377_v42 = vcombine.high %v412_v36, %v416_v37  ;;  %3491 = vmatprep.subr.bf16.mxu1 %v4513_v35  ;;  %v4376_v49 = vcombine.low %v412_v36, %v416_v37  ;;  %v299_v36 = vcombine.high %v5325_v25, %v5325_v25  ;;  %v5341_v37 = vpack.c.bf16 %v5275_v5, %v5275_v5 }
  0x7f   : > { %v544_v39 = vld [vmem:[%s5226_s9 + $0x720] sm:$0xff]  ;;  %3492 = vmatpush2.bf16.msra.mxu1 %v4512_v41 }
  0x80   : > { %v4505_v43 = vcombine.high %v540_v38, %v544_v39  ;;  %v404_v45 = vld [vmem:[%s5226_s9 + $0x2c0] sm:$0xff]  ;;  %3452 = vmatprep.subr.bf16.mxu0 %v4377_v42  ;;  %v4504_v50 = vcombine.low %v540_v38, %v544_v39 }
  0x81   : > { %v408_v46 = vld [vmem:[%s5226_s9 + $0x2e0] sm:$0xff]  ;;  %3453 = vmatpush2.bf16.msra.mxu0 %v4376_v49 }
  0x82   : > { %v532_v47 = vld [vmem:[%s5226_s9 + $0x6c0] sm:$0xff]  ;;  %v4369_v51 = vcombine.high %v404_v45, %v408_v46  ;;  %3493 = vmatprep.subr.bf16.mxu1 %v4505_v43  ;;  %v4368_v58 = vcombine.low %v404_v45, %v408_v46  ;;  %v5345_v43 = vpack.c.bf16 %v298_v32, %v298_v32  ;;  %v5350_v46 = vpack.c.bf16 %v299_v36, %v299_v36 }
  0x83   : > { %v536_v48 = vld [vmem:[%s5226_s9 + $0x6e0] sm:$0xff]  ;;  %3494 = vmatpush2.bf16.msra.mxu1 %v4504_v50 }
  0x84   : > { %v4497_v52 = vcombine.high %v532_v47, %v536_v48  ;;  %v396_v54 = vld [vmem:[%s5226_s9 + $0x280] sm:$0xff]  ;;  %3454 = vmatprep.subr.bf16.mxu0 %v4369_v51  ;;  %v4496_v59 = vcombine.low %v532_v47, %v536_v48 }
  0x85   : > { %v400_v55 = vld [vmem:[%s5226_s9 + $0x2a0] sm:$0xff]  ;;  %3455 = vmatpush2.bf16.msra.mxu0 %v4368_v58 }
  0x86   : > { %v524_v56 = vld [vmem:[%s5226_s9 + $0x680] sm:$0xff]  ;;  %v4361_v60 = vcombine.high %v396_v54, %v400_v55  ;;  %3495 = vmatprep.subr.bf16.mxu1 %v4497_v52  ;;  %v4360_v3 = vcombine.low %v396_v54, %v400_v55 }
  0x87   : > { %v528_v57 = vld [vmem:[%s5226_s9 + $0x6a0] sm:$0xff]  ;;  %3496 = vmatpush2.bf16.msra.mxu1 %v4496_v59 }
  0x88   : > { %v4489_v61 = vcombine.high %v524_v56, %v528_v57  ;;  %v388_v62 = vld [vmem:[%s5226_s9 + $0x240] sm:$0xff]  ;;  %3456 = vmatprep.subr.bf16.mxu0 %v4361_v60  ;;  %v4488_v6 = vcombine.low %v524_v56, %v528_v57 }
  0x89   : > { %v392_v0 = vld [vmem:[%s5226_s9 + $0x260] sm:$0xff]  ;;  %3457 = vmatpush2.bf16.msra.mxu0 %v4360_v3 }
  0x8a   : > { %v516_v1 = vld [vmem:[%s5226_s9 + $0x640] sm:$0xff]  ;;  %v4353_v7 = vcombine.high %v388_v62, %v392_v0  ;;  %3497 = vmatprep.subr.bf16.mxu1 %v4489_v61  ;;  %v4352_v15 = vcombine.low %v388_v62, %v392_v0 }
  0x8b   : > { %v520_v2 = vld [vmem:[%s5226_s9 + $0x660] sm:$0xff]  ;;  %3498 = vmatpush2.bf16.msra.mxu1 %v4488_v6 }
  0x8c   : > { %v4481_v8 = vcombine.high %v516_v1, %v520_v2  ;;  %v380_v9 = vld [vmem:[%s5226_s9 + $0x200] sm:$0xff]  ;;  %3458 = vmatprep.subr.bf16.mxu0 %v4353_v7  ;;  %v4480_v17 = vcombine.low %v516_v1, %v520_v2 }
  0x8d   : > { %v384_v10 = vld [vmem:[%s5226_s9 + $0x220] sm:$0xff]  ;;  %3459 = vmatpush2.bf16.msra.mxu0 %v4352_v15 }
  0x8e   : > { %v508_v12 = vld [vmem:[%s5226_s9 + $0x600] sm:$0xff]  ;;  %v4345_v18 = vcombine.high %v380_v9, %v384_v10  ;;  %3499 = vmatprep.subr.bf16.mxu1 %v4481_v8  ;;  %v4344_v26 = vcombine.low %v380_v9, %v384_v10 }
  0x8f   : > { %v512_v13 = vld [vmem:[%s5226_s9 + $0x620] sm:$0xff]  ;;  %3500 = vmatpush2.bf16.msra.mxu1 %v4480_v17 }
  0x90   : > { %v4473_v19 = vcombine.high %v508_v12, %v512_v13  ;;  %v628_v20 = vld [vmem:[%s5226_s9 + $0x9c0] sm:$0xff]  ;;  %3460 = vmatprep.subr.bf16.mxu0 %v4345_v18  ;;  %v4472_v27 = vcombine.low %v508_v12, %v512_v13 }
  0x91   : > { %v632_v21 = vld [vmem:[%s5226_s9 + $0x9e0] sm:$0xff]  ;;  %3461 = vmatpush2.bf16.msra.mxu0 %v4344_v26 }
  0x92   : > { %v756_v23 = vld [vmem:[%s5226_s9 + $0xdc0] sm:$0xff]  ;;  %v4593_v28 = vcombine.high %v628_v20, %v632_v21  ;;  %3501 = vmatprep.subr.bf16.mxu1 %v4473_v19  ;;  %v4592_v38 = vcombine.low %v628_v20, %v632_v21 }
  0x93   : > { %v760_v24 = vld [vmem:[%s5226_s9 + $0xde0] sm:$0xff]  ;;  %3502 = vmatpush2.bf16.msra.mxu1 %v4472_v27 }
  0x94   : > { %v4721_v29 = vcombine.high %v756_v23, %v760_v24  ;;  %v620_v30 = vld [vmem:[%s5226_s9 + $0x980] sm:$0xff]  ;;  %3512 = vmatprep.subr.bf16.mxu0 %v4593_v28  ;;  %v4720_v39 = vcombine.low %v756_v23, %v760_v24  ;;  %3463 = vmatmul.mubr.bf16.vlgmr.msra.gmra.mxu0 %v5333_v33 }
  0x95   : > { %v624_v31 = vld [vmem:[%s5226_s9 + $0x9a0] sm:$0xff]  ;;  %3513 = vmatpush1.bf16.msra.mxu0 %v4592_v38  ;;  %3544 = vmatprep.mubr.bf16.mxu0 %v5345_v43 }
  0x96   : > { %v748_v34 = vld [vmem:[%s5226_s9 + $0xd80] sm:$0xff]  ;;  %v4585_v40 = vcombine.high %v620_v30, %v624_v31  ;;  %3553 = vmatprep.subr.bf16.mxu1 %v4721_v29  ;;  %3504 = vmatmul.mubr.bf16.vlgmr.msra.gmra.mxu1 %v5341_v37  ;;  %v4584_v47 = vcombine.low %v620_v30, %v624_v31 }
  0x97   : > { %v752_v35 = vld [vmem:[%s5226_s9 + $0xda0] sm:$0xff]  ;;  %3554 = vmatpush1.bf16.msra.mxu1 %v4720_v39  ;;  %3585 = vmatprep.mubr.bf16.mxu1 %v5350_v46 }
  0x98   : > { %v4713_v63 = vcombine.high %v748_v34, %v752_v35  ;;  %v612_v41 = vld [vmem:[%s5226_s9 + $0x940] sm:$0xff]  ;;  %3514 = vmatprep.subr.bf16.mxu0 %v4585_v40  ;;  %v4712_v48 = vcombine.low %v748_v34, %v752_v35 }
  0x99   : > { %v616_v42 = vld [vmem:[%s5226_s9 + $0x960] sm:$0xff]  ;;  %3515 = vmatpush1.bf16.msra.mxu0 %v4584_v47 }
  0x9a   : > { %v740_v45 = vld [vmem:[%s5226_s9 + $0xd40] sm:$0xff]  ;;  %v4577_v49 = vcombine.high %v612_v41, %v616_v42  ;;  %3555 = vmatprep.subr.bf16.mxu1 %v4713_v63  ;;  %v4576_v56 = vcombine.low %v612_v41, %v616_v42 }
  0x9b   : > { %v744_v5 = vld [vmem:[%s5226_s9 + $0xd60] sm:$0xff]  ;;  %3556 = vmatpush1.bf16.msra.mxu1 %v4712_v48 }
  0x9c   : > { %v4705_v50 = vcombine.high %v740_v45, %v744_v5  ;;  %v604_v51 = vld [vmem:[%s5226_s9 + $0x900] sm:$0xff]  ;;  %3516 = vmatprep.subr.bf16.mxu0 %v4577_v49  ;;  %v4704_v57 = vcombine.low %v740_v45, %v744_v5 }
  0x9d   : > { %v608_v52 = vld [vmem:[%s5226_s9 + $0x920] sm:$0xff]  ;;  %3517 = vmatpush1.bf16.msra.mxu0 %v4576_v56 }
  0x9e   : > { %v732_v54 = vld [vmem:[%s5226_s9 + $0xd00] sm:$0xff]  ;;  %v4569_v58 = vcombine.high %v604_v51, %v608_v52  ;;  %3557 = vmatprep.subr.bf16.mxu1 %v4705_v50  ;;  %v4568_v1 = vcombine.low %v604_v51, %v608_v52 }
  0x9f   : > { %v736_v55 = vld [vmem:[%s5226_s9 + $0xd20] sm:$0xff]  ;;  %3558 = vmatpush1.bf16.msra.mxu1 %v4704_v57 }
  0xa0   : > { %v4697_v59 = vcombine.high %v732_v54, %v736_v55  ;;  %v596_v60 = vld [vmem:[%s5226_s9 + $0x8c0] sm:$0xff]  ;;  %3518 = vmatprep.subr.bf16.mxu0 %v4569_v58  ;;  %v4696_v2 = vcombine.low %v732_v54, %v736_v55 }
  0xa1   : > { %v600_v61 = vld [vmem:[%s5226_s9 + $0x8e0] sm:$0xff]  ;;  %3519 = vmatpush1.bf16.msra.mxu0 %v4568_v1 }
  0xa2   : > { %v724_v62 = vld [vmem:[%s5226_s9 + $0xcc0] sm:$0xff]  ;;  %v4561_v3 = vcombine.high %v596_v60, %v600_v61  ;;  %3559 = vmatprep.subr.bf16.mxu1 %v4697_v59  ;;  %v4560_v10 = vcombine.low %v596_v60, %v600_v61 }
  0xa3   : > { %v728_v0 = vld [vmem:[%s5226_s9 + $0xce0] sm:$0xff]  ;;  %3560 = vmatpush1.bf16.msra.mxu1 %v4696_v2 }
  0xa4   : > { %v4689_v4 = vcombine.high %v724_v62, %v728_v0  ;;  %v588_v6 = vld [vmem:[%s5226_s9 + $0x880] sm:$0xff]  ;;  %3520 = vmatprep.subr.bf16.mxu0 %v4561_v3  ;;  %v4688_v12 = vcombine.low %v724_v62, %v728_v0 }
  0xa5   : > { %v592_v7 = vld [vmem:[%s5226_s9 + $0x8a0] sm:$0xff]  ;;  %3521 = vmatpush1.bf16.msra.mxu0 %v4560_v10 }
  0xa6   : > { %v716_v8 = vld [vmem:[%s5226_s9 + $0xc80] sm:$0xff]  ;;  %v4553_v13 = vcombine.high %v588_v6, %v592_v7  ;;  %3561 = vmatprep.subr.bf16.mxu1 %v4689_v4  ;;  %v4552_v20 = vcombine.low %v588_v6, %v592_v7 }
  0xa7   : > { %v720_v9 = vld [vmem:[%s5226_s9 + $0xca0] sm:$0xff]  ;;  %3562 = vmatpush1.bf16.msra.mxu1 %v4688_v12 }
  0xa8   : > { %v4681_v14 = vcombine.high %v716_v8, %v720_v9  ;;  %v580_v15 = vld [vmem:[%s5226_s9 + $0x840] sm:$0xff]  ;;  %3522 = vmatprep.subr.bf16.mxu0 %v4553_v13  ;;  %v4680_v21 = vcombine.low %v716_v8, %v720_v9 }
  0xa9   : > { %v584_v17 = vld [vmem:[%s5226_s9 + $0x860] sm:$0xff]  ;;  %3523 = vmatpush1.bf16.msra.mxu0 %v4552_v20 }
  0xaa   : > { %v708_v18 = vld [vmem:[%s5226_s9 + $0xc40] sm:$0xff]  ;;  %v4545_v23 = vcombine.high %v580_v15, %v584_v17  ;;  %3563 = vmatprep.subr.bf16.mxu1 %v4681_v14  ;;  %v4544_v30 = vcombine.low %v580_v15, %v584_v17 }
  0xab   : > { %v712_v19 = vld [vmem:[%s5226_s9 + $0xc60] sm:$0xff]  ;;  %3564 = vmatpush1.bf16.msra.mxu1 %v4680_v21 }
  0xac   : > { %v4673_v24 = vcombine.high %v708_v18, %v712_v19  ;;  %v572_v26 = vld [vmem:[%s5226_s9 + $0x800] sm:$0xff]  ;;  %3524 = vmatprep.subr.bf16.mxu0 %v4545_v23  ;;  %v4672_v31 = vcombine.low %v708_v18, %v712_v19 }
  0xad   : > { %v576_v27 = vld [vmem:[%s5226_s9 + $0x820] sm:$0xff]  ;;  %3525 = vmatpush1.bf16.msra.mxu0 %v4544_v30 }
  0xae   : > { %v700_v28 = vld [vmem:[%s5226_s9 + $0xc00] sm:$0xff]  ;;  %v4537_v32 = vcombine.high %v572_v26, %v576_v27  ;;  %3565 = vmatprep.subr.bf16.mxu1 %v4673_v24  ;;  %v4536_v40 = vcombine.low %v572_v26, %v576_v27 }
  0xaf   : > { %v704_v29 = vld [vmem:[%s5226_s9 + $0xc20] sm:$0xff]  ;;  %3566 = vmatpush1.bf16.msra.mxu1 %v4672_v31 }
  0xb0   : > { %v4665_v34 = vcombine.high %v700_v28, %v704_v29  ;;  %v692_v35 = vld [vmem:[%s5226_s9 + $0xbc0] sm:$0xff]  ;;  %3526 = vmatprep.subr.bf16.mxu0 %v4537_v32  ;;  %v4664_v63 = vcombine.low %v700_v28, %v704_v29 }
  0xb1   : > { %v696_v36 = vld [vmem:[%s5226_s9 + $0xbe0] sm:$0xff]  ;;  %3527 = vmatpush1.bf16.msra.mxu0 %v4536_v40 }
  0xb2   : > { %v820_v38 = vld [vmem:[%s5226_s9 + $0xfc0] sm:$0xff]  ;;  %v4657_v41 = vcombine.high %v692_v35, %v696_v36  ;;  %3567 = vmatprep.subr.bf16.mxu1 %v4665_v34  ;;  %v4656_v49 = vcombine.low %v692_v35, %v696_v36 }
  0xb3   : > { %v824_v39 = vld [vmem:[%s5226_s9 + $0xfe0] sm:$0xff]  ;;  %3568 = vmatpush1.bf16.msra.mxu1 %v4664_v63 }
  0xb4   : > { %v4785_v42 = vcombine.high %v820_v38, %v824_v39  ;;  %v684_v45 = vld [vmem:[%s5226_s9 + $0xb80] sm:$0xff]  ;;  %3528 = vmatprep.subr.bf16.mxu0 %v4657_v41  ;;  %v4784_v50 = vcombine.low %v820_v38, %v824_v39 }
  0xb5   : > { %v688_v5 = vld [vmem:[%s5226_s9 + $0xba0] sm:$0xff]  ;;  %3529 = vmatpush2.bf16.msra.mxu0 %v4656_v49  ;;  %v501_v49 = vld [vmem:[%s5226_s9 + $0x5c8] sm:$0xff] }
  0xb6   : > { %v812_v47 = vld [vmem:[%s5226_s9 + $0xf80] sm:$0xff]  ;;  %v4649_v51 = vcombine.high %v684_v45, %v688_v5  ;;  %3569 = vmatprep.subr.bf16.mxu1 %v4785_v42  ;;  %v4648_v58 = vcombine.low %v684_v45, %v688_v5 }
  0xb7   : > { %v816_v48 = vld [vmem:[%s5226_s9 + $0xfa0] sm:$0xff]  ;;  %3570 = vmatpush2.bf16.msra.mxu1 %v4784_v50  ;;  %v505_v50 = vld [vmem:[%s5226_s9 + $0x5e8] sm:$0xff] }
  0xb8   : > { %v4777_v52 = vcombine.high %v812_v47, %v816_v48  ;;  %v676_v54 = vld [vmem:[%s5226_s9 + $0xb40] sm:$0xff]  ;;  %3530 = vmatprep.subr.bf16.mxu0 %v4649_v51  ;;  %v4776_v59 = vcombine.low %v812_v47, %v816_v48  ;;  %v373_v47 = vld [vmem:[%s5226_s9 + $0x1c8] sm:$0xff] }
  0xb9   : > { %v680_v55 = vld [vmem:[%s5226_s9 + $0xb60] sm:$0xff]  ;;  %3531 = vmatpush2.bf16.msra.mxu0 %v4648_v58  ;;  %v377_v48 = vld [vmem:[%s5226_s9 + $0x1e8] sm:$0xff]  ;;  %v5415_v58 = vpack.c.bf16 %v5320_v22, %v5320_v22 }
  0xba   : > { %v804_v56 = vld [vmem:[%s5226_s9 + $0xf40] sm:$0xff]  ;;  %v4641_v60 = vcombine.high %v676_v54, %v680_v55  ;;  %3571 = vmatprep.subr.bf16.mxu1 %v4777_v52  ;;  %v4640_v3 = vcombine.low %v676_v54, %v680_v55  ;;  %v4339_v54 = vcombine.high %v373_v47, %v377_v48  ;;  %v4467_v55 = vcombine.high %v501_v49, %v505_v50  ;;  %v361_v22 = vld [vmem:[%s5226_s9 + $0x168] sm:$0xff] }
  0xbb   : > { %v808_v57 = vld [vmem:[%s5226_s9 + $0xf60] sm:$0xff]  ;;  %3572 = vmatpush2.bf16.msra.mxu1 %v4776_v59  ;;  %v493_v59 = vld [vmem:[%s5226_s9 + $0x588] sm:$0xff] }
  0xbc   : > { %v4769_v61 = vcombine.high %v804_v56, %v808_v57  ;;  %v668_v62 = vld [vmem:[%s5226_s9 + $0xb00] sm:$0xff]  ;;  %3532 = vmatprep.subr.bf16.mxu0 %v4641_v60  ;;  %v4768_v4 = vcombine.low %v804_v56, %v808_v57  ;;  %v365_v56 = vld [vmem:[%s5226_s9 + $0x188] sm:$0xff] }
  0xbd   : > { %v672_v0 = vld [vmem:[%s5226_s9 + $0xb20] sm:$0xff]  ;;  %3533 = vmatpush2.bf16.msra.mxu0 %v4640_v3  ;;  %v369_v57 = vld [vmem:[%s5226_s9 + $0x1a8] sm:$0xff] }
  0xbe   : > { %v796_v1 = vld [vmem:[%s5226_s9 + $0xf00] sm:$0xff]  ;;  %v4633_v6 = vcombine.high %v668_v62, %v672_v0  ;;  %3573 = vmatprep.subr.bf16.mxu1 %v4769_v61  ;;  %v4632_v13 = vcombine.low %v668_v62, %v672_v0  ;;  %v497_v60 = vld [vmem:[%s5226_s9 + $0x5a8] sm:$0xff]  ;;  %v5421_v61 = vpack.c.bf16 %v5325_v25, %v5325_v25  ;;  %v4338_v62 = vcombine.low %v373_v47, %v377_v48 }
  0xbf   : > { %v800_v2 = vld [vmem:[%s5226_s9 + $0xf20] sm:$0xff]  ;;  %3574 = vmatpush2.bf16.msra.mxu1 %v4768_v4  ;;  %v4466_v0 = vcombine.low %v501_v49, %v505_v50  ;;  %v357_v3 = vld [vmem:[%s5226_s9 + $0x148] sm:$0xff]  ;;  %v4330_v25 = vcombine.low %v365_v56, %v369_v57 }
  0xc0   : > { %v4761_v7 = vcombine.high %v796_v1, %v800_v2  ;;  %v660_v8 = vld [vmem:[%s5226_s9 + $0xac0] sm:$0xff]  ;;  %3534 = vmatprep.subr.bf16.mxu0 %v4633_v6  ;;  %v4760_v14 = vcombine.low %v796_v1, %v800_v2  ;;  %v4331_v1 = vcombine.high %v365_v56, %v369_v57  ;;  %v4459_v2 = vcombine.high %v493_v59, %v497_v60  ;;  %v485_v4 = vld [vmem:[%s5226_s9 + $0x548] sm:$0xff] }
  0xc1   : > { %v664_v9 = vld [vmem:[%s5226_s9 + $0xae0] sm:$0xff]  ;;  %3535 = vmatpush2.bf16.msra.mxu0 %v4632_v13  ;;  %v489_v6 = vld [vmem:[%s5226_s9 + $0x568] sm:$0xff] }
  0xc2   : > { %v788_v10 = vld [vmem:[%s5226_s9 + $0xec0] sm:$0xff]  ;;  %v4625_v15 = vcombine.high %v660_v8, %v664_v9  ;;  %3575 = vmatprep.subr.bf16.mxu1 %v4761_v7  ;;  %v4624_v23 = vcombine.low %v660_v8, %v664_v9  ;;  %v4458_v7 = vcombine.low %v493_v59, %v497_v60  ;;  %v4323_v8 = vcombine.high %v357_v3, %v361_v22  ;;  %v477_v13 = vld [vmem:[%s5226_s9 + $0x508] sm:$0xff] }
  0xc3   : > { %v792_v12 = vld [vmem:[%s5226_s9 + $0xee0] sm:$0xff]  ;;  %3576 = vmatpush2.bf16.msra.mxu1 %v4760_v14  ;;  %v4451_v9 = vcombine.high %v485_v4, %v489_v6  ;;  %v481_v14 = vld [vmem:[%s5226_s9 + $0x528] sm:$0xff] }
  0xc4   : > { %v4753_v17 = vcombine.high %v788_v10, %v792_v12  ;;  %v652_v18 = vld [vmem:[%s5226_s9 + $0xa80] sm:$0xff]  ;;  %3536 = vmatprep.subr.bf16.mxu0 %v4625_v15  ;;  %v4752_v24 = vcombine.low %v788_v10, %v792_v12  ;;  %v349_v10 = vld [vmem:[%s5226_s9 + $0x108] sm:$0xff]  ;;  %v4322_v15 = vcombine.low %v357_v3, %v361_v22 }
  0xc5   : > { %v656_v19 = vld [vmem:[%s5226_s9 + $0xaa0] sm:$0xff]  ;;  %3537 = vmatpush2.bf16.msra.mxu0 %v4624_v23  ;;  %v353_v12 = vld [vmem:[%s5226_s9 + $0x128] sm:$0xff] }
  0xc6   : > { %v780_v20 = vld [vmem:[%s5226_s9 + $0xe80] sm:$0xff]  ;;  %v4617_v26 = vcombine.high %v652_v18, %v656_v19  ;;  %3577 = vmatprep.subr.bf16.mxu1 %v4753_v17  ;;  %v4616_v32 = vcombine.low %v652_v18, %v656_v19  ;;  %v4450_v17 = vcombine.low %v485_v4, %v489_v6  ;;  %v4315_v18 = vcombine.high %v349_v10, %v353_v12  ;;  %v469_v23 = vld [vmem:[%s5226_s9 + $0x4c8] sm:$0xff] }
  0xc7   : > { %v784_v21 = vld [vmem:[%s5226_s9 + $0xea0] sm:$0xff]  ;;  %3578 = vmatpush2.bf16.msra.mxu1 %v4752_v24  ;;  %v4443_v19 = vcombine.high %v477_v13, %v481_v14  ;;  %v473_v24 = vld [vmem:[%s5226_s9 + $0x4e8] sm:$0xff] }
  0xc8   : > { %v4745_v27 = vcombine.high %v780_v20, %v784_v21  ;;  %v644_v28 = vld [vmem:[%s5226_s9 + $0xa40] sm:$0xff]  ;;  %3538 = vmatprep.subr.bf16.mxu0 %v4617_v26  ;;  %v4744_v34 = vcombine.low %v780_v20, %v784_v21  ;;  %v341_v20 = vld [vmem:[%s5226_s9 + $0xc8] sm:$0xff]  ;;  %v4314_v26 = vcombine.low %v349_v10, %v353_v12 }
  0xc9   : > { %v648_v29 = vld [vmem:[%s5226_s9 + $0xa60] sm:$0xff]  ;;  %3539 = vmatpush2.bf16.msra.mxu0 %v4616_v32  ;;  %v345_v21 = vld [vmem:[%s5226_s9 + $0xe8] sm:$0xff] }
  0xca   : > { %v772_v30 = vld [vmem:[%s5226_s9 + $0xe40] sm:$0xff]  ;;  %v4609_v35 = vcombine.high %v644_v28, %v648_v29  ;;  %3579 = vmatprep.subr.bf16.mxu1 %v4745_v27  ;;  %v4608_v41 = vcombine.low %v644_v28, %v648_v29  ;;  %v4442_v27 = vcombine.low %v477_v13, %v481_v14  ;;  %v4307_v28 = vcombine.high %v341_v20, %v345_v21  ;;  %v461_v32 = vld [vmem:[%s5226_s9 + $0x488] sm:$0xff] }
  0xcb   : > { %v776_v31 = vld [vmem:[%s5226_s9 + $0xe60] sm:$0xff]  ;;  %3580 = vmatpush2.bf16.msra.mxu1 %v4744_v34  ;;  %v4435_v29 = vcombine.high %v469_v23, %v473_v24  ;;  %v465_v34 = vld [vmem:[%s5226_s9 + $0x4a8] sm:$0xff] }
  0xcc   : > { %v4737_v36 = vcombine.high %v772_v30, %v776_v31  ;;  %v636_v38 = vld [vmem:[%s5226_s9 + $0xa00] sm:$0xff]  ;;  %3540 = vmatprep.subr.bf16.mxu0 %v4609_v35  ;;  %v4736_v42 = vcombine.low %v772_v30, %v776_v31  ;;  %v333_v30 = vld [vmem:[%s5226_s9 + $0x88] sm:$0xff]  ;;  %v4306_v35 = vcombine.low %v341_v20, %v345_v21 }
  0xcd   : > { %v640_v39 = vld [vmem:[%s5226_s9 + $0xa20] sm:$0xff]  ;;  %3541 = vmatpush2.bf16.msra.mxu0 %v4608_v41  ;;  %v337_v31 = vld [vmem:[%s5226_s9 + $0xa8] sm:$0xff] }
  0xce   : > { %v764_v40 = vld [vmem:[%s5226_s9 + $0xe00] sm:$0xff]  ;;  %v4601_v45 = vcombine.high %v636_v38, %v640_v39  ;;  %3581 = vmatprep.subr.bf16.mxu1 %v4737_v36  ;;  %v4600_v51 = vcombine.low %v636_v38, %v640_v39  ;;  %v4434_v36 = vcombine.low %v469_v23, %v473_v24  ;;  %v4299_v38 = vcombine.high %v333_v30, %v337_v31  ;;  %v453_v41 = vld [vmem:[%s5226_s9 + $0x448] sm:$0xff] }
  0xcf   : > { %v768_v63 = vld [vmem:[%s5226_s9 + $0xe20] sm:$0xff]  ;;  %3582 = vmatpush2.bf16.msra.mxu1 %v4736_v42  ;;  %v4427_v39 = vcombine.high %v461_v32, %v465_v34  ;;  %v457_v42 = vld [vmem:[%s5226_s9 + $0x468] sm:$0xff] }
  0xd0   : > { %v4729_v5 = vcombine.high %v764_v40, %v768_v63  ;;  %3542 = vmatprep.subr.bf16.mxu0 %v4601_v45  ;;  %v4728_v52 = vcombine.low %v764_v40, %v768_v63  ;;  %v325_v40 = vld [vmem:[%s5226_s9 + $0x48] sm:$0xff]  ;;  %v4298_v45 = vcombine.low %v333_v30, %v337_v31  ;;  %v4419_v48 = vcombine.high %v453_v41, %v457_v42 }
  0xd1   : > { %3543 = vmatpush2.bf16.msra.mxu0 %v4600_v51  ;;  %v329_v63 = vld [vmem:[%s5226_s9 + $0x68] sm:$0xff] }
  0xd2   : > { %3583 = vmatprep.subr.bf16.mxu1 %v4729_v5  ;;  %3594 = vmatprep.subr.bf16.mxu0 %v4339_v54  ;;  %v4426_v5 = vcombine.low %v461_v32, %v465_v34  ;;  %v4291_v47 = vcombine.high %v325_v40, %v329_v63  ;;  %v317_v49 = vld [vmem:[%s5226_s9 + $0x8] sm:$0xff]  ;;  %v4290_v54 = vcombine.low %v325_v40, %v329_v63 }
  0xd3   : > { %3584 = vmatpush2.bf16.msra.mxu1 %v4728_v52  ;;  %v321_v50 = vld [vmem:[%s5226_s9 + $0x28] sm:$0xff] }
  0xd4   : > { %3635 = vmatprep.subr.bf16.mxu1 %v4467_v55  ;;  %3545 = vmatmul.mubr.bf16.vlgmr.msra.gmra.mxu0 %v5415_v58  ;;  %v445_v51 = vld [vmem:[%s5226_s9 + $0x408] sm:$0xff]  ;;  %v4418_v55 = vcombine.low %v453_v41, %v457_v42  ;;  %v4283_v56 = vcombine.high %v317_v49, %v321_v50 }
  0xd5   : > { %3595 = vmatpush1.bf16.msra.mxu0 %v4338_v62  ;;  %3626 = vmatprep.mubr.bf16.mxu0 %v5279_v11  ;;  %v449_v52 = vld [vmem:[%s5226_s9 + $0x428] sm:$0xff] }
  0xd6   : > { %3586 = vmatmul.mubr.bf16.vlgmr.msra.gmra.mxu1 %v5421_v61  ;;  %3596 = vmatprep.subr.bf16.mxu0 %v4331_v1  ;;  %v4411_v57 = vcombine.high %v445_v51, %v449_v52  ;;  %v437_v59 = vld [vmem:[%s5226_s9 + $0x3c8] sm:$0xff]  ;;  %v4282_v1 = vcombine.low %v317_v49, %v321_v50 }
  0xd7   : > { %3636 = vmatpush1.bf16.msra.mxu1 %v4466_v0  ;;  %3667 = vmatprep.mubr.bf16.mxu1 %v5286_v16  ;;  %v441_v60 = vld [vmem:[%s5226_s9 + $0x3e8] sm:$0xff] }
  0xd8   : > { %3637 = vmatprep.subr.bf16.mxu1 %v4459_v2  ;;  %v565_v62 = vld [vmem:[%s5226_s9 + $0x7c8] sm:$0xff]  ;;  %v4410_v2 = vcombine.low %v445_v51, %v449_v52  ;;  %v4403_v3 = vcombine.high %v437_v59, %v441_v60 }
  0xd9   : > { %3597 = vmatpush1.bf16.msra.mxu0 %v4330_v25  ;;  %v569_v0 = vld [vmem:[%s5226_s9 + $0x7e8] sm:$0xff] }
  0xda   : > { %3598 = vmatprep.subr.bf16.mxu0 %v4323_v8  ;;  %v4531_v22 = vcombine.high %v565_v62, %v569_v0  ;;  %v429_v4 = vld [vmem:[%s5226_s9 + $0x388] sm:$0xff]  ;;  %v4402_v8 = vcombine.low %v437_v59, %v441_v60 }
  0xdb   : > { %3638 = vmatpush1.bf16.msra.mxu1 %v4458_v7  ;;  %v433_v6 = vld [vmem:[%s5226_s9 + $0x3a8] sm:$0xff] }
  0xdc   : > { %3639 = vmatprep.subr.bf16.mxu1 %v4451_v9  ;;  %v557_v25 = vld [vmem:[%s5226_s9 + $0x788] sm:$0xff]  ;;  %v4530_v9 = vcombine.low %v565_v62, %v569_v0  ;;  %v4395_v10 = vcombine.high %v429_v4, %v433_v6 }
  0xdd   : > { %3599 = vmatpush1.bf16.msra.mxu0 %v4322_v15  ;;  %v561_v7 = vld [vmem:[%s5226_s9 + $0x7a8] sm:$0xff] }
  0xde   : > { %3600 = vmatprep.subr.bf16.mxu0 %v4315_v18  ;;  %v4523_v12 = vcombine.high %v557_v25, %v561_v7  ;;  %v421_v13 = vld [vmem:[%s5226_s9 + $0x348] sm:$0xff]  ;;  %v4394_v18 = vcombine.low %v429_v4, %v433_v6 }
  0xdf   : > { %3640 = vmatpush1.bf16.msra.mxu1 %v4450_v17  ;;  %v425_v14 = vld [vmem:[%s5226_s9 + $0x368] sm:$0xff] }
  0xe0   : > { %3641 = vmatprep.subr.bf16.mxu1 %v4443_v19  ;;  %v549_v15 = vld [vmem:[%s5226_s9 + $0x748] sm:$0xff]  ;;  %v4522_v19 = vcombine.low %v557_v25, %v561_v7  ;;  %v4387_v20 = vcombine.high %v421_v13, %v425_v14 }
  0xe1   : > { %3601 = vmatpush1.bf16.msra.mxu0 %v4314_v26  ;;  %v553_v17 = vld [vmem:[%s5226_s9 + $0x768] sm:$0xff] }
  0xe2   : > { %3602 = vmatprep.subr.bf16.mxu0 %v4307_v28  ;;  %v4515_v21 = vcombine.high %v549_v15, %v553_v17  ;;  %v413_v23 = vld [vmem:[%s5226_s9 + $0x308] sm:$0xff]  ;;  %v4386_v28 = vcombine.low %v421_v13, %v425_v14 }
  0xe3   : > { %3642 = vmatpush1.bf16.msra.mxu1 %v4442_v27  ;;  %v417_v24 = vld [vmem:[%s5226_s9 + $0x328] sm:$0xff] }
  0xe4   : > { %3643 = vmatprep.subr.bf16.mxu1 %v4435_v29  ;;  %v541_v26 = vld [vmem:[%s5226_s9 + $0x708] sm:$0xff]  ;;  %v4514_v29 = vcombine.low %v549_v15, %v553_v17  ;;  %v4379_v30 = vcombine.high %v413_v23, %v417_v24 }
  0xe5   : > { %3603 = vmatpush1.bf16.msra.mxu0 %v4306_v35  ;;  %v545_v27 = vld [vmem:[%s5226_s9 + $0x728] sm:$0xff] }
  0xe6   : > { %3604 = vmatprep.subr.bf16.mxu0 %v4299_v38  ;;  %v4507_v31 = vcombine.high %v541_v26, %v545_v27  ;;  %v405_v32 = vld [vmem:[%s5226_s9 + $0x2c8] sm:$0xff]  ;;  %v4378_v38 = vcombine.low %v413_v23, %v417_v24 }
  0xe7   : > { %3644 = vmatpush1.bf16.msra.mxu1 %v4434_v36  ;;  %v409_v34 = vld [vmem:[%s5226_s9 + $0x2e8] sm:$0xff] }
  0xe8   : > { %3645 = vmatprep.subr.bf16.mxu1 %v4427_v39  ;;  %v533_v35 = vld [vmem:[%s5226_s9 + $0x6c8] sm:$0xff]  ;;  %v4506_v39 = vcombine.low %v541_v26, %v545_v27  ;;  %v4371_v40 = vcombine.high %v405_v32, %v409_v34 }
  0xe9   : > { %3605 = vmatpush1.bf16.msra.mxu0 %v4298_v45  ;;  %v537_v36 = vld [vmem:[%s5226_s9 + $0x6e8] sm:$0xff] }
  0xea   : > { %3606 = vmatprep.subr.bf16.mxu0 %v4291_v47  ;;  %v4499_v63 = vcombine.high %v533_v35, %v537_v36  ;;  %v397_v41 = vld [vmem:[%s5226_s9 + $0x288] sm:$0xff]  ;;  %v4370_v47 = vcombine.low %v405_v32, %v409_v34 }
  0xeb   : > { %3646 = vmatpush1.bf16.msra.mxu1 %v4426_v5  ;;  %v401_v42 = vld [vmem:[%s5226_s9 + $0x2a8] sm:$0xff] }
  0xec   : > { %3647 = vmatprep.subr.bf16.mxu1 %v4419_v48  ;;  %v525_v45 = vld [vmem:[%s5226_s9 + $0x688] sm:$0xff]  ;;  %v4498_v48 = vcombine.low %v533_v35, %v537_v36  ;;  %v4363_v49 = vcombine.high %v397_v41, %v401_v42 }
  0xed   : > { %3607 = vmatpush1.bf16.msra.mxu0 %v4290_v54  ;;  %v529_v5 = vld [vmem:[%s5226_s9 + $0x6a8] sm:$0xff] }
  0xee   : > { %3608 = vmatprep.subr.bf16.mxu0 %v4283_v56  ;;  %v4491_v50 = vcombine.high %v525_v45, %v529_v5  ;;  %v389_v51 = vld [vmem:[%s5226_s9 + $0x248] sm:$0xff]  ;;  %v4362_v56 = vcombine.low %v397_v41, %v401_v42 }
  0xef   : > { %3648 = vmatpush1.bf16.msra.mxu1 %v4418_v55  ;;  %v393_v52 = vld [vmem:[%s5226_s9 + $0x268] sm:$0xff] }
  0xf0   : > { %3649 = vmatprep.subr.bf16.mxu1 %v4411_v57  ;;  %v517_v54 = vld [vmem:[%s5226_s9 + $0x648] sm:$0xff]  ;;  %v4490_v57 = vcombine.low %v525_v45, %v529_v5  ;;  %v4355_v59 = vcombine.high %v389_v51, %v393_v52 }
  0xf1   : > { %3609 = vmatpush1.bf16.msra.mxu0 %v4282_v1  ;;  %v521_v55 = vld [vmem:[%s5226_s9 + $0x668] sm:$0xff] }
  0xf2   : > { %3610 = vmatprep.subr.bf16.mxu0 %v4403_v3  ;;  %v4483_v60 = vcombine.high %v517_v54, %v521_v55  ;;  %v381_v62 = vld [vmem:[%s5226_s9 + $0x208] sm:$0xff]  ;;  %v4354_v3 = vcombine.low %v389_v51, %v393_v52 }
  0xf3   : > { %3650 = vmatpush1.bf16.msra.mxu1 %v4410_v2  ;;  %v385_v0 = vld [vmem:[%s5226_s9 + $0x228] sm:$0xff] }
  0xf4   : > { %3651 = vmatprep.subr.bf16.mxu1 %v4531_v22  ;;  %v509_v1 = vld [vmem:[%s5226_s9 + $0x608] sm:$0xff]  ;;  %v4482_v22 = vcombine.low %v517_v54, %v521_v55  ;;  %v4347_v4 = vcombine.high %v381_v62, %v385_v0 }
  0xf5   : > { %3611 = vmatpush2.bf16.msra.mxu0 %v4402_v8  ;;  %v513_v2 = vld [vmem:[%s5226_s9 + $0x628] sm:$0xff] }
  0xf6   : > { %3612 = vmatprep.subr.bf16.mxu0 %v4395_v10  ;;  %v4475_v6 = vcombine.high %v509_v1, %v513_v2  ;;  %v629_v25 = vld [vmem:[%s5226_s9 + $0x9c8] sm:$0xff]  ;;  %v4346_v10 = vcombine.low %v381_v62, %v385_v0 }
  0xf7   : > { %3652 = vmatpush2.bf16.msra.mxu1 %v4530_v9  ;;  %v633_v7 = vld [vmem:[%s5226_s9 + $0x9e8] sm:$0xff] }
  0xf8   : > { %3653 = vmatprep.subr.bf16.mxu1 %v4523_v12  ;;  %v757_v8 = vld [vmem:[%s5226_s9 + $0xdc8] sm:$0xff]  ;;  %v4474_v12 = vcombine.low %v509_v1, %v513_v2  ;;  %v4595_v13 = vcombine.high %v629_v25, %v633_v7 }
  0xf9   : > { %3613 = vmatpush2.bf16.msra.mxu0 %v4394_v18  ;;  %v761_v9 = vld [vmem:[%s5226_s9 + $0xde8] sm:$0xff] }
  0xfa   : > { %3614 = vmatprep.subr.bf16.mxu0 %v4387_v20  ;;  %v4723_v14 = vcombine.high %v757_v8, %v761_v9  ;;  %v621_v15 = vld [vmem:[%s5226_s9 + $0x988] sm:$0xff]  ;;  %v4594_v20 = vcombine.low %v629_v25, %v633_v7 }
  0xfb   : > { %3654 = vmatpush2.bf16.msra.mxu1 %v4522_v19  ;;  %v625_v17 = vld [vmem:[%s5226_s9 + $0x9a8] sm:$0xff] }
  0xfc   : > { %3655 = vmatprep.subr.bf16.mxu1 %v4515_v21  ;;  %v749_v18 = vld [vmem:[%s5226_s9 + $0xd88] sm:$0xff]  ;;  %v4722_v21 = vcombine.low %v757_v8, %v761_v9  ;;  %v4587_v23 = vcombine.high %v621_v15, %v625_v17 }
  0xfd   : > { %3615 = vmatpush2.bf16.msra.mxu0 %v4386_v28  ;;  %v753_v19 = vld [vmem:[%s5226_s9 + $0xda8] sm:$0xff] }
  0xfe   : > { %3616 = vmatprep.subr.bf16.mxu0 %v4379_v30  ;;  %v4715_v24 = vcombine.high %v749_v18, %v753_v19  ;;  %v613_v26 = vld [vmem:[%s5226_s9 + $0x948] sm:$0xff]  ;;  %v4586_v30 = vcombine.low %v621_v15, %v625_v17 }
  0xff   : > { %3656 = vmatpush2.bf16.msra.mxu1 %v4514_v29  ;;  %v617_v27 = vld [vmem:[%s5226_s9 + $0x968] sm:$0xff] }
 0x100   : > { %3657 = vmatprep.subr.bf16.mxu1 %v4507_v31  ;;  %v741_v28 = vld [vmem:[%s5226_s9 + $0xd48] sm:$0xff]  ;;  %v4714_v31 = vcombine.low %v749_v18, %v753_v19  ;;  %v4579_v32 = vcombine.high %v613_v26, %v617_v27 }
 0x101   : > { %3617 = vmatpush2.bf16.msra.mxu0 %v4378_v38  ;;  %v745_v29 = vld [vmem:[%s5226_s9 + $0xd68] sm:$0xff] }
 0x102   : > { %3618 = vmatprep.subr.bf16.mxu0 %v4371_v40  ;;  %v4707_v34 = vcombine.high %v741_v28, %v745_v29  ;;  %v605_v35 = vld [vmem:[%s5226_s9 + $0x908] sm:$0xff]  ;;  %v4578_v40 = vcombine.low %v613_v26, %v617_v27 }
 0x103   : > { %3658 = vmatpush2.bf16.msra.mxu1 %v4506_v39  ;;  %v609_v36 = vld [vmem:[%s5226_s9 + $0x928] sm:$0xff] }
 0x104   : > { %3659 = vmatprep.subr.bf16.mxu1 %v4499_v63  ;;  %v733_v38 = vld [vmem:[%s5226_s9 + $0xd08] sm:$0xff]  ;;  %v4706_v63 = vcombine.low %v741_v28, %v745_v29  ;;  %v4571_v41 = vcombine.high %v605_v35, %v609_v36 }
 0x105   : > { %3619 = vmatpush2.bf16.msra.mxu0 %v4370_v47  ;;  %v737_v39 = vld [vmem:[%s5226_s9 + $0xd28] sm:$0xff] }
 0x106   : > { %3620 = vmatprep.subr.bf16.mxu0 %v4363_v49  ;;  %v4699_v42 = vcombine.high %v733_v38, %v737_v39  ;;  %v597_v45 = vld [vmem:[%s5226_s9 + $0x8c8] sm:$0xff]  ;;  %v4570_v49 = vcombine.low %v605_v35, %v609_v36 }
 0x107   : > { %3660 = vmatpush2.bf16.msra.mxu1 %v4498_v48  ;;  %v601_v5 = vld [vmem:[%s5226_s9 + $0x8e8] sm:$0xff] }
 0x108   : > { %3661 = vmatprep.subr.bf16.mxu1 %v4491_v50  ;;  %v725_v47 = vld [vmem:[%s5226_s9 + $0xcc8] sm:$0xff]  ;;  %v4698_v50 = vcombine.low %v733_v38, %v737_v39  ;;  %v4563_v51 = vcombine.high %v597_v45, %v601_v5 }
 0x109   : > { %3621 = vmatpush2.bf16.msra.mxu0 %v4362_v56  ;;  %v729_v48 = vld [vmem:[%s5226_s9 + $0xce8] sm:$0xff] }
 0x10a   : > { %3622 = vmatprep.subr.bf16.mxu0 %v4355_v59  ;;  %v4691_v52 = vcombine.high %v725_v47, %v729_v48  ;;  %v589_v54 = vld [vmem:[%s5226_s9 + $0x888] sm:$0xff]  ;;  %v4562_v59 = vcombine.low %v597_v45, %v601_v5 }
 0x10b   : > { %3662 = vmatpush2.bf16.msra.mxu1 %v4490_v57  ;;  %v593_v55 = vld [vmem:[%s5226_s9 + $0x8a8] sm:$0xff] }
 0x10c   : > { %3663 = vmatprep.subr.bf16.mxu1 %v4483_v60  ;;  %v717_v56 = vld [vmem:[%s5226_s9 + $0xc88] sm:$0xff]  ;;  %v4690_v60 = vcombine.low %v725_v47, %v729_v48  ;;  %v4555_v62 = vcombine.high %v589_v54, %v593_v55 }
 0x10d   : > { %3623 = vmatpush2.bf16.msra.mxu0 %v4354_v3  ;;  %v721_v57 = vld [vmem:[%s5226_s9 + $0xca8] sm:$0xff] }
 0x10e   : > { %3624 = vmatprep.subr.bf16.mxu0 %v4347_v4  ;;  %v4683_v0 = vcombine.high %v717_v56, %v721_v57  ;;  %v581_v1 = vld [vmem:[%s5226_s9 + $0x848] sm:$0xff]  ;;  %v4554_v4 = vcombine.low %v589_v54, %v593_v55 }
 0x10f   : > { %3664 = vmatpush2.bf16.msra.mxu1 %v4482_v22  ;;  %v585_v2 = vld [vmem:[%s5226_s9 + $0x868] sm:$0xff] }
 0x110   : > { %3665 = vmatprep.subr.bf16.mxu1 %v4475_v6  ;;  %v709_v3 = vld [vmem:[%s5226_s9 + $0xc48] sm:$0xff]  ;;  %v4682_v6 = vcombine.low %v717_v56, %v721_v57  ;;  %v4547_v25 = vcombine.high %v581_v1, %v585_v2 }
 0x111   : > { %3625 = vmatpush2.bf16.msra.mxu0 %v4346_v10  ;;  %v713_v22 = vld [vmem:[%s5226_s9 + $0xc68] sm:$0xff] }
 0x112   : > { %3676 = vmatprep.subr.bf16.mxu0 %v4595_v13  ;;  %v4675_v7 = vcombine.high %v709_v3, %v713_v22  ;;  %v573_v8 = vld [vmem:[%s5226_s9 + $0x808] sm:$0xff]  ;;  %v4546_v13 = vcombine.low %v581_v1, %v585_v2 }
 0x113   : > { %3666 = vmatpush2.bf16.msra.mxu1 %v4474_v12  ;;  %v577_v9 = vld [vmem:[%s5226_s9 + $0x828] sm:$0xff] }
 0x114   : > { %3717 = vmatprep.subr.bf16.mxu1 %v4723_v14  ;;  %3627 = vmatmul.mubr.bf16.vlgmr.msra.gmra.mxu0 %v5333_v33  ;;  %v701_v10 = vld [vmem:[%s5226_s9 + $0xc08] sm:$0xff]  ;;  %v4674_v14 = vcombine.low %v709_v3, %v713_v22  ;;  %v4539_v15 = vcombine.high %v573_v8, %v577_v9 }
 0x115   : > { %3677 = vmatpush1.bf16.msra.mxu0 %v4594_v20  ;;  %3708 = vmatprep.mubr.bf16.mxu0 %v5345_v43  ;;  %v705_v12 = vld [vmem:[%s5226_s9 + $0xc28] sm:$0xff] }
 0x116   : > { %3668 = vmatmul.mubr.bf16.vlgmr.msra.gmra.mxu1 %v5341_v37  ;;  %3678 = vmatprep.subr.bf16.mxu0 %v4587_v23  ;;  %v4667_v17 = vcombine.high %v701_v10, %v705_v12  ;;  %v693_v18 = vld [vmem:[%s5226_s9 + $0xbc8] sm:$0xff]  ;;  %v4538_v23 = vcombine.low %v573_v8, %v577_v9 }
 0x117   : > { %3718 = vmatpush1.bf16.msra.mxu1 %v4722_v21  ;;  %3749 = vmatprep.mubr.bf16.mxu1 %v5350_v46  ;;  %v697_v19 = vld [vmem:[%s5226_s9 + $0xbe8] sm:$0xff] }
 0x118   : > { %3719 = vmatprep.subr.bf16.mxu1 %v4715_v24  ;;  %v821_v20 = vld [vmem:[%s5226_s9 + $0xfc8] sm:$0xff]  ;;  %v4666_v24 = vcombine.low %v701_v10, %v705_v12  ;;  %v4659_v26 = vcombine.high %v693_v18, %v697_v19 }
 0x119   : > { %3679 = vmatpush1.bf16.msra.mxu0 %v4586_v30  ;;  %v825_v21 = vld [vmem:[%s5226_s9 + $0xfe8] sm:$0xff] }
 0x11a   : > { %3680 = vmatprep.subr.bf16.mxu0 %v4579_v32  ;;  %v4787_v27 = vcombine.high %v821_v20, %v825_v21  ;;  %v685_v28 = vld [vmem:[%s5226_s9 + $0xb88] sm:$0xff]  ;;  %v4658_v32 = vcombine.low %v693_v18, %v697_v19 }
 0x11b   : > { %3720 = vmatpush1.bf16.msra.mxu1 %v4714_v31  ;;  %v689_v29 = vld [vmem:[%s5226_s9 + $0xba8] sm:$0xff] }
 0x11c   : > { %3721 = vmatprep.subr.bf16.mxu1 %v4707_v34  ;;  %v813_v30 = vld [vmem:[%s5226_s9 + $0xf88] sm:$0xff]  ;;  %v4786_v34 = vcombine.low %v821_v20, %v825_v21  ;;  %v4651_v35 = vcombine.high %v685_v28, %v689_v29 }
 0x11d   : > { %3681 = vmatpush1.bf16.msra.mxu0 %v4578_v40  ;;  %v817_v31 = vld [vmem:[%s5226_s9 + $0xfa8] sm:$0xff] }
 0x11e   : > { %3682 = vmatprep.subr.bf16.mxu0 %v4571_v41  ;;  %v4779_v36 = vcombine.high %v813_v30, %v817_v31  ;;  %v677_v38 = vld [vmem:[%s5226_s9 + $0xb48] sm:$0xff]  ;;  %v4650_v41 = vcombine.low %v685_v28, %v689_v29 }
 0x11f   : > { %3722 = vmatpush1.bf16.msra.mxu1 %v4706_v63  ;;  %v681_v39 = vld [vmem:[%s5226_s9 + $0xb68] sm:$0xff] }
 0x120   : > { %3723 = vmatprep.subr.bf16.mxu1 %v4699_v42  ;;  %v805_v40 = vld [vmem:[%s5226_s9 + $0xf48] sm:$0xff]  ;;  %v4778_v42 = vcombine.low %v813_v30, %v817_v31  ;;  %v4643_v45 = vcombine.high %v677_v38, %v681_v39  ;;  %v374_v30 = vld [vmem:[%s5226_s9 + $0x1d0] sm:$0xff] }
 0x121   : > { %3683 = vmatpush1.bf16.msra.mxu0 %v4570_v49  ;;  %v809_v63 = vld [vmem:[%s5226_s9 + $0xf68] sm:$0xff]  ;;  %v378_v31 = vld [vmem:[%s5226_s9 + $0x1f0] sm:$0xff] }
 0x122   : > { %3684 = vmatprep.subr.bf16.mxu0 %v4563_v51  ;;  %v4771_v5 = vcombine.high %v805_v40, %v809_v63  ;;  %v669_v47 = vld [vmem:[%s5226_s9 + $0xb08] sm:$0xff]  ;;  %v4642_v51 = vcombine.low %v677_v38, %v681_v39 }
 0x123   : > { %3724 = vmatpush1.bf16.msra.mxu1 %v4698_v50  ;;  %v673_v48 = vld [vmem:[%s5226_s9 + $0xb28] sm:$0xff] }
 0x124   : > { %3725 = vmatprep.subr.bf16.mxu1 %v4691_v52  ;;  %v797_v49 = vld [vmem:[%s5226_s9 + $0xf08] sm:$0xff]  ;;  %v4770_v52 = vcombine.low %v805_v40, %v809_v63  ;;  %v4635_v54 = vcombine.high %v669_v47, %v673_v48  ;;  %v4341_v40 = vcombine.high %v374_v30, %v378_v31 }
 0x125   : > { %3685 = vmatpush1.bf16.msra.mxu0 %v4562_v59  ;;  %v801_v50 = vld [vmem:[%s5226_s9 + $0xf28] sm:$0xff] }
 0x126   : > { %3686 = vmatprep.subr.bf16.mxu0 %v4555_v62  ;;  %v4763_v55 = vcombine.high %v797_v49, %v801_v50  ;;  %v661_v56 = vld [vmem:[%s5226_s9 + $0xac8] sm:$0xff]  ;;  %v4634_v62 = vcombine.low %v669_v47, %v673_v48  ;;  %v498_v47 = vld [vmem:[%s5226_s9 + $0x5b0] sm:$0xff] }
 0x127   : > { %3726 = vmatpush1.bf16.msra.mxu1 %v4690_v60  ;;  %v665_v57 = vld [vmem:[%s5226_s9 + $0xae8] sm:$0xff] }
 0x128   : > { %3727 = vmatprep.subr.bf16.mxu1 %v4683_v0  ;;  %v789_v59 = vld [vmem:[%s5226_s9 + $0xec8] sm:$0xff]  ;;  %v4762_v0 = vcombine.low %v797_v49, %v801_v50  ;;  %v4627_v1 = vcombine.high %v661_v56, %v665_v57  ;;  %v4340_v49 = vcombine.low %v374_v30, %v378_v31 }
 0x129   : > { %3687 = vmatpush1.bf16.msra.mxu0 %v4554_v4  ;;  %v793_v60 = vld [vmem:[%s5226_s9 + $0xee8] sm:$0xff] }
 0x12a   : > { %3688 = vmatprep.subr.bf16.mxu0 %v4547_v25  ;;  %v4755_v2 = vcombine.high %v789_v59, %v793_v60  ;;  %v653_v3 = vld [vmem:[%s5226_s9 + $0xa88] sm:$0xff]  ;;  %v4626_v25 = vcombine.low %v661_v56, %v665_v57  ;;  %v362_v56 = vld [vmem:[%s5226_s9 + $0x170] sm:$0xff] }
 0x12b   : > { %3728 = vmatpush1.bf16.msra.mxu1 %v4682_v6  ;;  %v657_v22 = vld [vmem:[%s5226_s9 + $0xaa8] sm:$0xff] }
 0x12c   : > { %3729 = vmatprep.subr.bf16.mxu1 %v4675_v7  ;;  %v781_v4 = vld [vmem:[%s5226_s9 + $0xe88] sm:$0xff]  ;;  %v4754_v7 = vcombine.low %v789_v59, %v793_v60  ;;  %v4619_v8 = vcombine.high %v653_v3, %v657_v22  ;;  %v486_v59 = vld [vmem:[%s5226_s9 + $0x550] sm:$0xff] }
 0x12d   : > { %3689 = vmatpush1.bf16.msra.mxu0 %v4546_v13  ;;  %v785_v6 = vld [vmem:[%s5226_s9 + $0xea8] sm:$0xff]  ;;  %v490_v60 = vld [vmem:[%s5226_s9 + $0x570] sm:$0xff] }
 0x12e   : > { %3690 = vmatprep.subr.bf16.mxu0 %v4539_v15  ;;  %v4747_v9 = vcombine.high %v781_v4, %v785_v6  ;;  %v645_v10 = vld [vmem:[%s5226_s9 + $0xa48] sm:$0xff]  ;;  %v4618_v15 = vcombine.low %v653_v3, %v657_v22 }
 0x12f   : > { %3730 = vmatpush1.bf16.msra.mxu1 %v4674_v14  ;;  %v649_v12 = vld [vmem:[%s5226_s9 + $0xa68] sm:$0xff] }
 0x130   : > { %3731 = vmatprep.subr.bf16.mxu1 %v4667_v17  ;;  %v773_v13 = vld [vmem:[%s5226_s9 + $0xe48] sm:$0xff]  ;;  %v4746_v17 = vcombine.low %v781_v4, %v785_v6  ;;  %v4611_v18 = vcombine.high %v645_v10, %v649_v12 }
 0x131   : > { %3691 = vmatpush1.bf16.msra.mxu0 %v4538_v23  ;;  %v777_v14 = vld [vmem:[%s5226_s9 + $0xe68] sm:$0xff] }
 0x132   : > { %3692 = vmatprep.subr.bf16.mxu0 %v4659_v26  ;;  %v4739_v19 = vcombine.high %v773_v13, %v777_v14  ;;  %v637_v20 = vld [vmem:[%s5226_s9 + $0xa08] sm:$0xff]  ;;  %v4610_v26 = vcombine.low %v645_v10, %v649_v12  ;;  %v478_v12 = vld [vmem:[%s5226_s9 + $0x510] sm:$0xff] }
 0x133   : > { %3732 = vmatpush1.bf16.msra.mxu1 %v4666_v24  ;;  %v641_v21 = vld [vmem:[%s5226_s9 + $0xa28] sm:$0xff] }
 0x134   : > { %3733 = vmatprep.subr.bf16.mxu1 %v4787_v27  ;;  %v765_v23 = vld [vmem:[%s5226_s9 + $0xe08] sm:$0xff]  ;;  %v4738_v27 = vcombine.low %v773_v13, %v777_v14  ;;  %v4603_v28 = vcombine.high %v637_v20, %v641_v21  ;;  %v482_v13 = vld [vmem:[%s5226_s9 + $0x530] sm:$0xff] }
 0x135   : > { %3693 = vmatpush2.bf16.msra.mxu0 %v4658_v32  ;;  %v769_v24 = vld [vmem:[%s5226_s9 + $0xe28] sm:$0xff]  ;;  %v502_v32 = vld [vmem:[%s5226_s9 + $0x5d0] sm:$0xff]  ;;  %v4444_v30 = vcombine.low %v478_v12, %v482_v13 }
 0x136   : > { %3694 = vmatprep.subr.bf16.mxu0 %v4651_v35  ;;  %v4731_v29 = vcombine.high %v765_v23, %v769_v24  ;;  %v4602_v35 = vcombine.low %v637_v20, %v641_v21  ;;  %v4730_v38 = vcombine.low %v765_v23, %v769_v24  ;;  %v828_v39 = vld [vmem:[%s5557_s23] sm:$0xff]  ;;  %v4445_v23 = vcombine.high %v478_v12, %v482_v13  ;;  %v342_v24 = vld [vmem:[%s5226_s9 + $0xd0] sm:$0xff] }
 0x137   : > { %3734 = vmatpush2.bf16.msra.mxu1 %v4786_v34  ;;  %v506_v34 = vld [vmem:[%s5226_s9 + $0x5f0] sm:$0xff] }
 0x138   : > { %3735 = vmatprep.subr.bf16.mxu1 %v4779_v36  ;;  %v832_v36 = vsub.s32 0, %v5254_v44  ;;  %v4469_v63 = vcombine.high %v502_v32, %v506_v34  ;;  %v4468_v50 = vcombine.low %v502_v32, %v506_v34  ;;  %v334_v34 = vld [vmem:[%s5226_s9 + $0x90] sm:$0xff] }
 0x139   : > { %3695 = vmatpush2.bf16.msra.mxu0 %v4650_v41  ;;  %v836_v41 = vsub.s32 1, %v5254_v44  ;;  %v562_v12 = vld [vmem:[%s5226_s9 + $0x7b0] sm:$0xff] }
 0x13a   : > { %3696 = vmatprep.subr.bf16.mxu0 %v4643_v45  ;;  %v370_v45 = vld [vmem:[%s5226_s9 + $0x1b0] sm:$0xff]  ;;  %v833_v48 = vrot.slane %v828_v39, %v832_v36 }
 0x13b   : > { %3736 = vmatpush2.bf16.msra.mxu1 %v4778_v42  ;;  %v366_v42 = vld [vmem:[%s5226_s9 + $0x190] sm:$0xff] }
 0x13c   : > { %3737 = vmatprep.subr.bf16.mxu1 %v4771_v5  ;;  %v494_v5 = vld [vmem:[%s5226_s9 + $0x590] sm:$0xff] }
 0x13d   : > { %3697 = vmatpush2.bf16.msra.mxu0 %v4642_v51  ;;  %v4333_v51 = vcombine.high %v366_v42, %v370_v45  ;;  %v4460_v3 = vcombine.low %v494_v5, %v498_v47  ;;  %v462_v36 = vld [vmem:[%s5226_s9 + $0x490] sm:$0xff] }
 0x13e   : > { %3698 = vmatprep.subr.bf16.mxu0 %v4635_v54  ;;  %v4461_v54 = vcombine.high %v494_v5, %v498_v47  ;;  %v454_v5 = vld [vmem:[%s5226_s9 + $0x450] sm:$0xff] }
 0x13f   : > { %3738 = vmatpush2.bf16.msra.mxu1 %v4770_v52  ;;  %v837_v52 = vrot.slane %v828_v39, %v836_v41  ;;  %v458_v47 = vld [vmem:[%s5226_s9 + $0x470] sm:$0xff] }
 0x140   : > { %3739 = vmatprep.subr.bf16.mxu1 %v4763_v55  ;;  %v358_v55 = vld [vmem:[%s5226_s9 + $0x150] sm:$0xff] }
 0x141   : > { %3699 = vmatpush2.bf16.msra.mxu0 %v4634_v62  ;;  %v4325_v22 = vcombine.high %v358_v55, %v362_v56 }
 0x142   : > { %3700 = vmatprep.subr.bf16.mxu0 %v4627_v1  ;;  %v4332_v1 = vcombine.low %v366_v42, %v370_v45  ;;  %v326_v42 = vld [vmem:[%s5226_s9 + $0x50] sm:$0xff] }
 0x143   : > { %3740 = vmatpush2.bf16.msra.mxu1 %v4762_v0  ;;  %v330_v45 = vld [vmem:[%s5226_s9 + $0x70] sm:$0xff] }
 0x144   : > { %3741 = vmatprep.subr.bf16.mxu1 %v4755_v2 }
 0x145   : > { %3701 = vmatpush2.bf16.msra.mxu0 %v4626_v25 }
 0x146   : > { %3702 = vmatprep.subr.bf16.mxu0 %v4619_v8  ;;  %v350_v8 = vld [vmem:[%s5226_s9 + $0x110] sm:$0xff] }
 0x147   : > { %3742 = vmatpush2.bf16.msra.mxu1 %v4754_v7  ;;  %v4453_v7 = vcombine.high %v486_v59, %v490_v60 }
 0x148   : > { %3743 = vmatprep.subr.bf16.mxu1 %v4747_v9  ;;  %v354_v9 = vld [vmem:[%s5226_s9 + $0x130] sm:$0xff] }
 0x149   : > { %3703 = vmatpush2.bf16.msra.mxu0 %v4618_v15  ;;  %v4317_v20 = vcombine.high %v350_v8, %v354_v9 }
 0x14a   : > { %3704 = vmatprep.subr.bf16.mxu0 %v4611_v18 }
 0x14b   : > { %3744 = vmatpush2.bf16.msra.mxu1 %v4746_v17  ;;  %v4324_v17 = vcombine.low %v358_v55, %v362_v56  ;;  %v446_v55 = vld [vmem:[%s5226_s9 + $0x410] sm:$0xff] }
 0x14c   : > { %3745 = vmatprep.subr.bf16.mxu1 %v4739_v19  ;;  %v4452_v19 = vcombine.low %v486_v59, %v490_v60  ;;  %v450_v56 = vld [vmem:[%s5226_s9 + $0x430] sm:$0xff]  ;;  %v4420_v59 = vcombine.low %v454_v5, %v458_v47 }
 0x14d   : > { %3705 = vmatpush2.bf16.msra.mxu0 %v4610_v26  ;;  %v346_v26 = vld [vmem:[%s5226_s9 + $0xf0] sm:$0xff] }
 0x14e   : > { %3706 = vmatprep.subr.bf16.mxu0 %v4603_v28  ;;  %v474_v28 = vld [vmem:[%s5226_s9 + $0x4f0] sm:$0xff]  ;;  %v4309_v31 = vcombine.high %v342_v24, %v346_v26  ;;  %v4308_v39 = vcombine.low %v342_v24, %v346_v26 }
 0x14f   : > { %3746 = vmatpush2.bf16.msra.mxu1 %v4738_v27  ;;  %v470_v27 = vld [vmem:[%s5226_s9 + $0x4d0] sm:$0xff] }
 0x150   : > { %3747 = vmatprep.subr.bf16.mxu1 %v4731_v29  ;;  %v4316_v29 = vcombine.low %v350_v8, %v354_v9  ;;  %v4437_v32 = vcombine.high %v470_v27, %v474_v28  ;;  %v430_v8 = vld [vmem:[%s5226_s9 + $0x390] sm:$0xff] }
 0x151   : > { %3707 = vmatpush2.bf16.msra.mxu0 %v4602_v35  ;;  %v338_v35 = vld [vmem:[%s5226_s9 + $0xb0] sm:$0xff] }
 0x152   : > { %3758 = vmatprep.subr.bf16.mxu0 %v4341_v40  ;;  %v4436_v40 = vcombine.low %v470_v27, %v474_v28  ;;  %v434_v9 = vld [vmem:[%s5226_s9 + $0x3b0] sm:$0xff] }
 0x153   : > { %3748 = vmatpush2.bf16.msra.mxu1 %v4730_v38  ;;  %v466_v38 = vld [vmem:[%s5226_s9 + $0x4b0] sm:$0xff]  ;;  %v4396_v24 = vcombine.low %v430_v8, %v434_v9 }
 0x154   : > { %3799 = vmatprep.subr.bf16.mxu1 %v4469_v63  ;;  %v3464_v57 = vpop.f32.mrf.mxu0  ;;  %3709 = vmatmul.mubr.bf16.vlgmr.msra.gmra.mxu0 %v5415_v58  ;;  %v4301_v63 = vcombine.high %v334_v34, %v338_v35  ;;  %v4429_v41 = vcombine.high %v462_v36, %v466_v38 }
 0x155   : > { %v3465_v62 = vadd.f32 %v3464_v57, %v833_v48  ;;  %3759 = vmatpush1.bf16.msra.mxu0 %v4340_v49  ;;  %3790 = vmatprep.mubr.bf16.mxu0 %v5279_v11  ;;  %v4300_v48 = vcombine.low %v334_v34, %v338_v35  ;;  %v4428_v49 = vcombine.low %v462_v36, %v466_v38 }
 0x156   : > { %v3505_v0 = vpop.f32.mrf.mxu1  ;;  %3750 = vmatmul.mubr.bf16.vlgmr.msra.gmra.mxu1 %v5421_v61  ;;  %v3466_v2 = vpop.f32.mrf.mxu0  ;;  %3760 = vmatprep.subr.bf16.mxu0 %v4333_v51  ;;  %v4421_v51 = vcombine.high %v454_v5, %v458_v47  ;;  %v4292_v57 = vcombine.low %v326_v42, %v330_v45 }
 0x157   : > { %3800 = vmatpush1.bf16.msra.mxu1 %v4468_v50  ;;  %v5571_v4 = vadd.f32 %v3505_v0, %v3465_v62  ;;  %v3467_v6 = vadd.f32 %v3466_v2, %v837_v52  ;;  %3831 = vmatprep.mubr.bf16.mxu1 %v5286_v16  ;;  %v4293_v50 = vcombine.high %v326_v42, %v330_v45  ;;  %v318_v52 = vld [vmem:[%s5226_s9 + $0x10] sm:$0xff] }
 0x158   : > { %v3507_v25 = vpop.f32.mrf.mxu1  ;;  %3801 = vmatprep.subr.bf16.mxu1 %v4461_v54  ;;  %v3468_v10 = vpop.f32.mrf.mxu0  ;;  %v322_v54 = vld [vmem:[%s5226_s9 + $0x30] sm:$0xff]  ;;  %v4413_v62 = vcombine.high %v446_v55, %v450_v56 }
 0x159   : > { %v5579_v14 = vadd.f32 %v3507_v25, %v3467_v6  ;;  %3761 = vmatpush1.bf16.msra.mxu0 %v4332_v1  ;;  %v4285_v60 = vcombine.high %v318_v52, %v322_v54  ;;  %v438_v0 = vld [vmem:[%s5226_s9 + $0x3d0] sm:$0xff]  ;;  %v4412_v6 = vcombine.low %v446_v55, %v450_v56 }
 0x15a   : > { %v3509_v15 = vpop.f32.mrf.mxu1  ;;  %v3469_v18 = vpop.f32.mrf.mxu0  ;;  %3762 = vmatprep.subr.bf16.mxu0 %v4325_v22  ;;  %v442_v1 = vld [vmem:[%s5226_s9 + $0x3f0] sm:$0xff]  ;;  %v4284_v22 = vcombine.low %v318_v52, %v322_v54 }
 0x15b   : > { %3802 = vmatpush1.bf16.msra.mxu1 %v4460_v3  ;;  %v566_v2 = vld [vmem:[%s5226_s9 + $0x7d0] sm:$0xff]  ;;  %v4405_v25 = vcombine.high %v438_v0, %v442_v1  ;;  %v4404_v13 = vcombine.low %v438_v0, %v442_v1 }
 0x15c   : > { %v3510_v21 = vpop.f32.mrf.mxu1  ;;  %3803 = vmatprep.subr.bf16.mxu1 %v4453_v7  ;;  %v570_v3 = vld [vmem:[%s5226_s9 + $0x7f0] sm:$0xff] }
 0x15d   : > { %3763 = vmatpush1.bf16.msra.mxu0 %v4324_v17  ;;  %v4533_v7 = vcombine.high %v566_v2, %v570_v3  ;;  %v558_v10 = vld [vmem:[%s5226_s9 + $0x790] sm:$0xff]  ;;  %v4532_v15 = vcombine.low %v566_v2, %v570_v3  ;;  %v4397_v17 = vcombine.high %v430_v8, %v434_v9 }
 0x15e   : > { %3764 = vmatprep.subr.bf16.mxu0 %v4317_v20  ;;  %v4525_v18 = vcombine.high %v558_v10, %v562_v12  ;;  %v426_v20 = vld [vmem:[%s5226_s9 + $0x370] sm:$0xff]  ;;  %v4524_v26 = vcombine.low %v558_v10, %v562_v12 }
 0x15f   : > { %3804 = vmatpush1.bf16.msra.mxu1 %v4452_v19  ;;  %v422_v19 = vld [vmem:[%s5226_s9 + $0x350] sm:$0xff] }
 0x160   : > { %3805 = vmatprep.subr.bf16.mxu1 %v4445_v23  ;;  %v550_v21 = vld [vmem:[%s5226_s9 + $0x750] sm:$0xff]  ;;  %v4389_v27 = vcombine.high %v422_v19, %v426_v20  ;;  %v4388_v34 = vcombine.low %v422_v19, %v426_v20 }
 0x161   : > { %3765 = vmatpush1.bf16.msra.mxu0 %v4316_v29  ;;  %v554_v23 = vld [vmem:[%s5226_s9 + $0x770] sm:$0xff] }
 0x162   : > { %3766 = vmatprep.subr.bf16.mxu0 %v4309_v31  ;;  %v4517_v28 = vcombine.high %v550_v21, %v554_v23  ;;  %v414_v29 = vld [vmem:[%s5226_s9 + $0x310] sm:$0xff]  ;;  %v4516_v35 = vcombine.low %v550_v21, %v554_v23 }
 0x163   : > { %3806 = vmatpush1.bf16.msra.mxu1 %v4444_v30  ;;  %v418_v30 = vld [vmem:[%s5226_s9 + $0x330] sm:$0xff] }
 0x164   : > { %3807 = vmatprep.subr.bf16.mxu1 %v4437_v32  ;;  %v542_v31 = vld [vmem:[%s5226_s9 + $0x710] sm:$0xff]  ;;  %v4381_v36 = vcombine.high %v414_v29, %v418_v30  ;;  %v4380_v42 = vcombine.low %v414_v29, %v418_v30 }
 0x165   : > { %3767 = vmatpush1.bf16.msra.mxu0 %v4308_v39  ;;  %v546_v32 = vld [vmem:[%s5226_s9 + $0x730] sm:$0xff] }
 0x166   : > { %3768 = vmatprep.subr.bf16.mxu0 %v4301_v63  ;;  %v4509_v38 = vcombine.high %v542_v31, %v546_v32  ;;  %v406_v39 = vld [vmem:[%s5226_s9 + $0x2d0] sm:$0xff]  ;;  %v4508_v45 = vcombine.low %v542_v31, %v546_v32 }
 0x167   : > { %3808 = vmatpush1.bf16.msra.mxu1 %v4436_v40  ;;  %v410_v40 = vld [vmem:[%s5226_s9 + $0x2f0] sm:$0xff] }
 0x168   : > { %3809 = vmatprep.subr.bf16.mxu1 %v4429_v41  ;;  %v534_v63 = vld [vmem:[%s5226_s9 + $0x6d0] sm:$0xff]  ;;  %v4373_v5 = vcombine.high %v406_v39, %v410_v40  ;;  %v4372_v52 = vcombine.low %v406_v39, %v410_v40 }
 0x169   : > { %3769 = vmatpush1.bf16.msra.mxu0 %v4300_v48  ;;  %v538_v41 = vld [vmem:[%s5226_s9 + $0x6f0] sm:$0xff] }
 0x16a   : > { %3770 = vmatprep.subr.bf16.mxu0 %v4293_v50  ;;  %v4501_v47 = vcombine.high %v534_v63, %v538_v41  ;;  %v398_v48 = vld [vmem:[%s5226_s9 + $0x290] sm:$0xff]  ;;  %v4500_v54 = vcombine.low %v534_v63, %v538_v41 }
 0x16b   : > { %3810 = vmatpush1.bf16.msra.mxu1 %v4428_v49  ;;  %v402_v49 = vld [vmem:[%s5226_s9 + $0x2b0] sm:$0xff] }
 0x16c   : > { %3811 = vmatprep.subr.bf16.mxu1 %v4421_v51  ;;  %v526_v50 = vld [vmem:[%s5226_s9 + $0x690] sm:$0xff]  ;;  %v4365_v55 = vcombine.high %v398_v48, %v402_v49  ;;  %v4364_v0 = vcombine.low %v398_v48, %v402_v49 }
 0x16d   : > { %3771 = vmatpush1.bf16.msra.mxu0 %v4292_v57  ;;  %v530_v51 = vld [vmem:[%s5226_s9 + $0x6b0] sm:$0xff] }
 0x16e   : > { %3772 = vmatprep.subr.bf16.mxu0 %v4285_v60  ;;  %v4493_v56 = vcombine.high %v526_v50, %v530_v51  ;;  %v390_v57 = vld [vmem:[%s5226_s9 + $0x250] sm:$0xff]  ;;  %v4492_v1 = vcombine.low %v526_v50, %v530_v51 }
 0x16f   : > { %3812 = vmatpush1.bf16.msra.mxu1 %v4420_v59  ;;  %v394_v59 = vld [vmem:[%s5226_s9 + $0x270] sm:$0xff] }
 0x170   : > { %3813 = vmatprep.subr.bf16.mxu1 %v4413_v62  ;;  %v518_v60 = vld [vmem:[%s5226_s9 + $0x650] sm:$0xff]  ;;  %v4357_v2 = vcombine.high %v390_v57, %v394_v59  ;;  %v4356_v8 = vcombine.low %v390_v57, %v394_v59 }
 0x171   : > { %3773 = vmatpush1.bf16.msra.mxu0 %v4284_v22  ;;  %v522_v62 = vld [vmem:[%s5226_s9 + $0x670] sm:$0xff] }
 0x172   : > { %3774 = vmatprep.subr.bf16.mxu0 %v4405_v25  ;;  %v4485_v3 = vcombine.high %v518_v60, %v522_v62  ;;  %v382_v22 = vld [vmem:[%s5226_s9 + $0x210] sm:$0xff]  ;;  %v4484_v9 = vcombine.low %v518_v60, %v522_v62 }
 0x173   : > { %3814 = vmatpush1.bf16.msra.mxu1 %v4412_v6  ;;  %v386_v6 = vld [vmem:[%s5226_s9 + $0x230] sm:$0xff] }
 0x174   : > { %3815 = vmatprep.subr.bf16.mxu1 %v4533_v7  ;;  %v510_v25 = vld [vmem:[%s5226_s9 + $0x610] sm:$0xff]  ;;  %v4349_v10 = vcombine.high %v382_v22, %v386_v6  ;;  %v4348_v19 = vcombine.low %v382_v22, %v386_v6 }
 0x175   : > { %3775 = vmatpush2.bf16.msra.mxu0 %v4404_v13  ;;  %v514_v7 = vld [vmem:[%s5226_s9 + $0x630] sm:$0xff] }
 0x176   : > { %3776 = vmatprep.subr.bf16.mxu0 %v4397_v17  ;;  %v4477_v12 = vcombine.high %v510_v25, %v514_v7  ;;  %v630_v13 = vld [vmem:[%s5226_s9 + $0x9d0] sm:$0xff]  ;;  %v4476_v20 = vcombine.low %v510_v25, %v514_v7 }
 0x177   : > { %3816 = vmatpush2.bf16.msra.mxu1 %v4532_v15  ;;  %v634_v15 = vld [vmem:[%s5226_s9 + $0x9f0] sm:$0xff] }
 0x178   : > { %3817 = vmatprep.subr.bf16.mxu1 %v4525_v18  ;;  %v758_v17 = vld [vmem:[%s5226_s9 + $0xdd0] sm:$0xff]  ;;  %v4597_v21 = vcombine.high %v630_v13, %v634_v15  ;;  %v4596_v29 = vcombine.low %v630_v13, %v634_v15 }
 0x179   : > { %3777 = vmatpush2.bf16.msra.mxu0 %v4396_v24  ;;  %v762_v18 = vld [vmem:[%s5226_s9 + $0xdf0] sm:$0xff] }
 0x17a   : > { %3778 = vmatprep.subr.bf16.mxu0 %v4389_v27  ;;  %v4725_v23 = vcombine.high %v758_v17, %v762_v18  ;;  %v622_v24 = vld [vmem:[%s5226_s9 + $0x990] sm:$0xff]  ;;  %v4724_v30 = vcombine.low %v758_v17, %v762_v18 }
 0x17b   : > { %3818 = vmatpush2.bf16.msra.mxu1 %v4524_v26  ;;  %v626_v26 = vld [vmem:[%s5226_s9 + $0x9b0] sm:$0xff] }
 0x17c   : > { %3819 = vmatprep.subr.bf16.mxu1 %v4517_v28  ;;  %v750_v27 = vld [vmem:[%s5226_s9 + $0xd90] sm:$0xff]  ;;  %v4589_v31 = vcombine.high %v622_v24, %v626_v26  ;;  %v4588_v41 = vcombine.low %v622_v24, %v626_v26 }
 0x17d   : > { %3779 = vmatpush2.bf16.msra.mxu0 %v4388_v34  ;;  %v754_v28 = vld [vmem:[%s5226_s9 + $0xdb0] sm:$0xff] }
 0x17e   : > { %3780 = vmatprep.subr.bf16.mxu0 %v4381_v36  ;;  %v4717_v32 = vcombine.high %v750_v27, %v754_v28  ;;  %v614_v34 = vld [vmem:[%s5226_s9 + $0x950] sm:$0xff] }
 0x17f   : > { %3820 = vmatpush2.bf16.msra.mxu1 %v4516_v35  ;;  %v618_v35 = vld [vmem:[%s5226_s9 + $0x970] sm:$0xff] }
 0x180   : > { %3821 = vmatprep.subr.bf16.mxu1 %v4509_v38  ;;  %v742_v38 = vld [vmem:[%s5226_s9 + $0xd50] sm:$0xff] }
 0x181   : > { %3781 = vmatpush2.bf16.msra.mxu0 %v4380_v42  ;;  %v746_v39 = vld [vmem:[%s5226_s9 + $0xd70] sm:$0xff] }
 0x182   : > { %3782 = vmatprep.subr.bf16.mxu0 %v4373_v5  ;;  %v4581_v5 = vcombine.high %v614_v34, %v618_v35  ;;  %v606_v50 = vld [vmem:[%s5226_s9 + $0x910] sm:$0xff]  ;;  %v4708_v60 = vcombine.low %v742_v38, %v746_v39 }
 0x183   : > { %3822 = vmatpush2.bf16.msra.mxu1 %v4508_v45  ;;  %v4716_v45 = vcombine.low %v750_v27, %v754_v28  ;;  %v610_v51 = vld [vmem:[%s5226_s9 + $0x930] sm:$0xff] }
 0x184   : > { %3823 = vmatprep.subr.bf16.mxu1 %v4501_v47  ;;  %v4573_v62 = vcombine.high %v606_v50, %v610_v51  ;;  %v602_v22 = vld [vmem:[%s5226_s9 + $0x8f0] sm:$0xff]  ;;  %v4572_v7 = vcombine.low %v606_v50, %v610_v51 }
 0x185   : > { %3783 = vmatpush2.bf16.msra.mxu0 %v4372_v52  ;;  %v726_v6 = vld [vmem:[%s5226_s9 + $0xcd0] sm:$0xff] }
 0x186   : > { %3784 = vmatprep.subr.bf16.mxu0 %v4365_v55  ;;  %v738_v55 = vld [vmem:[%s5226_s9 + $0xd30] sm:$0xff] }
 0x187   : > { %3824 = vmatpush2.bf16.msra.mxu1 %v4500_v54  ;;  %v734_v54 = vld [vmem:[%s5226_s9 + $0xd10] sm:$0xff] }
 0x188   : > { %3825 = vmatprep.subr.bf16.mxu1 %v4493_v56  ;;  %v730_v25 = vld [vmem:[%s5226_s9 + $0xcf0] sm:$0xff] }
 0x189   : > { %3785 = vmatpush2.bf16.msra.mxu0 %v4364_v0  ;;  %v594_v13 = vld [vmem:[%s5226_s9 + $0x8b0] sm:$0xff] }
 0x18a   : > { %3786 = vmatprep.subr.bf16.mxu0 %v4357_v2  ;;  %v4701_v2 = vcombine.high %v734_v54, %v738_v55  ;;  %v718_v15 = vld [vmem:[%s5226_s9 + $0xc90] sm:$0xff] }
 0x18b   : > { %3826 = vmatpush2.bf16.msra.mxu1 %v4492_v1  ;;  %v722_v17 = vld [vmem:[%s5226_s9 + $0xcb0] sm:$0xff] }
 0x18c   : > { %3827 = vmatprep.subr.bf16.mxu1 %v4485_v3  ;;  %v598_v3 = vld [vmem:[%s5226_s9 + $0x8d0] sm:$0xff] }
 0x18d   : > { %3787 = vmatpush2.bf16.msra.mxu0 %v4356_v8  ;;  %v4700_v8 = vcombine.low %v734_v54, %v738_v55  ;;  %v4564_v18 = vcombine.low %v598_v3, %v602_v22  ;;  %v586_v24 = vld [vmem:[%s5226_s9 + $0x870] sm:$0xff] }
 0x18e   : > { %3788 = vmatprep.subr.bf16.mxu0 %v4349_v10  ;;  %v4693_v10 = vcombine.high %v726_v6, %v730_v25  ;;  %v710_v26 = vld [vmem:[%s5226_s9 + $0xc50] sm:$0xff] }
 0x18f   : > { %3828 = vmatpush2.bf16.msra.mxu1 %v4484_v9  ;;  %v4565_v9 = vcombine.high %v598_v3, %v602_v22  ;;  %v714_v27 = vld [vmem:[%s5226_s9 + $0xc70] sm:$0xff] }
 0x190   : > { %3829 = vmatprep.subr.bf16.mxu1 %v4477_v12  ;;  %v590_v12 = vld [vmem:[%s5226_s9 + $0x890] sm:$0xff] }
 0x191   : > { %3789 = vmatpush2.bf16.msra.mxu0 %v4348_v19  ;;  %v4692_v19 = vcombine.low %v726_v6, %v730_v25  ;;  %v4556_v28 = vcombine.low %v590_v12, %v594_v13  ;;  %v686_v51 = vld [vmem:[%s5226_s9 + $0xb90] sm:$0xff] }
 0x192   : > { %3840 = vmatprep.subr.bf16.mxu0 %v4597_v21  ;;  %v4685_v21 = vcombine.high %v718_v15, %v722_v17  ;;  %v814_v54 = vld [vmem:[%s5226_s9 + $0xf90] sm:$0xff] }
 0x193   : > { %3830 = vmatpush2.bf16.msra.mxu1 %v4476_v20  ;;  %v4557_v20 = vcombine.high %v590_v12, %v594_v13  ;;  %v818_v55 = vld [vmem:[%s5226_s9 + $0xfb0] sm:$0xff] }
 0x194   : > { %3881 = vmatprep.subr.bf16.mxu1 %v4725_v23  ;;  %v3546_v36 = vpop.f32.mrf.mxu0  ;;  %3791 = vmatmul.mubr.bf16.vlgmr.msra.gmra.mxu0 %v5333_v33  ;;  %v582_v23 = vld [vmem:[%s5226_s9 + $0x850] sm:$0xff]  ;;  %v4780_v6 = vcombine.low %v814_v54, %v818_v55 }
 0x195   : > { %v3547_v40 = vadd.f32 %v3546_v36, %v5571_v4  ;;  %3841 = vmatpush1.bf16.msra.mxu0 %v4596_v29  ;;  %v4709_v4 = vcombine.high %v742_v38, %v746_v39  ;;  %3872 = vmatprep.mubr.bf16.mxu0 %v5345_v43  ;;  %v4684_v29 = vcombine.low %v718_v15, %v722_v17  ;;  %v706_v36 = vld [vmem:[%s5226_s9 + $0xc30] sm:$0xff] }
 0x196   : > { %v3587_v63 = vpop.f32.mrf.mxu1  ;;  %3832 = vmatmul.mubr.bf16.vlgmr.msra.gmra.mxu1 %v5341_v37  ;;  %v3548_v42 = vpop.f32.mrf.mxu0  ;;  %3842 = vmatprep.subr.bf16.mxu0 %v4589_v31  ;;  %v4677_v31 = vcombine.high %v710_v26, %v714_v27  ;;  %v4548_v38 = vcombine.low %v582_v23, %v586_v24  ;;  %v4676_v39 = vcombine.low %v710_v26, %v714_v27  ;;  %v810_v3 = vld [vmem:[%s5226_s9 + $0xf70] sm:$0xff] }
 0x197   : > { %3882 = vmatpush1.bf16.msra.mxu1 %v4724_v30  ;;  %v5644_v47 = vadd.f32 %v3587_v63, %v3547_v40  ;;  %v3549_v48 = vadd.f32 %v3548_v42, %v5579_v14  ;;  %3913 = vmatprep.mubr.bf16.mxu1 %v5350_v46  ;;  %v4580_v14 = vcombine.low %v614_v34, %v618_v35  ;;  %v578_v34 = vld [vmem:[%s5226_s9 + $0x830] sm:$0xff] }
 0x198   : > { %v3589_v49 = vpop.f32.mrf.mxu1  ;;  %3883 = vmatprep.subr.bf16.mxu1 %v4717_v32  ;;  %v3550_v52 = vpop.f32.mrf.mxu0  ;;  %v4549_v30 = vcombine.high %v582_v23, %v586_v24  ;;  %v574_v32 = vld [vmem:[%s5226_s9 + $0x810] sm:$0xff] }
 0x199   : > { %v5653_v56 = vadd.f32 %v3589_v49, %v3549_v48  ;;  %3843 = vmatpush1.bf16.msra.mxu0 %v4588_v41  ;;  %v702_v35 = vld [vmem:[%s5226_s9 + $0xc10] sm:$0xff]  ;;  %v4541_v40 = vcombine.high %v574_v32, %v578_v34  ;;  %v4540_v48 = vcombine.low %v574_v32, %v578_v34 }
 0x19a   : > { %v3591_v57 = vpop.f32.mrf.mxu1  ;;  %v3551_v59 = vpop.f32.mrf.mxu0  ;;  %3844 = vmatprep.subr.bf16.mxu0 %v4581_v5  ;;  %v4669_v63 = vcombine.high %v702_v35, %v706_v36  ;;  %v694_v41 = vld [vmem:[%s5226_s9 + $0xbd0] sm:$0xff]  ;;  %v4668_v49 = vcombine.low %v702_v35, %v706_v36 }
 0x19b   : > { %3884 = vmatpush1.bf16.msra.mxu1 %v4716_v45  ;;  %v4094_v0 = vcombine.low %v5644_v47, %v5653_v56  ;;  %v698_v42 = vld [vmem:[%s5226_s9 + $0xbf0] sm:$0xff]  ;;  %v723_v47 = vld [vmem:[%s5226_s9 + $0xcb8] sm:$0xff] }
 0x19c   : > { %v3592_v1 = vpop.f32.mrf.mxu1  ;;  %3885 = vmatprep.subr.bf16.mxu1 %v4709_v4  ;;  %v822_v45 = vld [vmem:[%s5226_s9 + $0xfd0] sm:$0xff]  ;;  %v4661_v4 = vcombine.high %v694_v41, %v698_v42  ;;  %v4660_v57 = vcombine.low %v694_v41, %v698_v42 }
 0x19d   : > { %3845 = vmatpush1.bf16.msra.mxu0 %v4580_v14  ;;  %v826_v5 = vld [vmem:[%s5226_s9 + $0xff0] sm:$0xff] }
 0x19e   : > { %3846 = vmatprep.subr.bf16.mxu0 %v4573_v62  ;;  %v4789_v50 = vcombine.high %v822_v45, %v826_v5  ;;  %v690_v52 = vld [vmem:[%s5226_s9 + $0xbb0] sm:$0xff]  ;;  %v4788_v14 = vcombine.low %v822_v45, %v826_v5 }
 0x19f   : > { %3886 = vmatpush1.bf16.msra.mxu1 %v4708_v60  ;;  %v4653_v59 = vcombine.high %v686_v51, %v690_v52  ;;  %v4781_v60 = vcombine.high %v814_v54, %v818_v55  ;;  %v678_v62 = vld [vmem:[%s5226_s9 + $0xb50] sm:$0xff]  ;;  %v4652_v22 = vcombine.low %v686_v51, %v690_v52 }
 0x1a0   : > { %3887 = vmatprep.subr.bf16.mxu1 %v4701_v2  ;;  %v682_v1 = vld [vmem:[%s5226_s9 + $0xb70] sm:$0xff] }
 0x1a1   : > { %3847 = vmatpush1.bf16.msra.mxu0 %v4572_v7  ;;  %v806_v2 = vld [vmem:[%s5226_s9 + $0xf50] sm:$0xff]  ;;  %v4645_v25 = vcombine.high %v678_v62, %v682_v1  ;;  %v4644_v13 = vcombine.low %v678_v62, %v682_v1  ;;  %v507_v62 = vld [vmem:[%s5226_s9 + $0x5f8] sm:$0xff] }
 0x1a2   : > { %3848 = vmatprep.subr.bf16.mxu0 %v4565_v9  ;;  %v4773_v7 = vcombine.high %v806_v2, %v810_v3  ;;  %v674_v9 = vld [vmem:[%s5226_s9 + $0xb30] sm:$0xff]  ;;  %v4772_v15 = vcombine.low %v806_v2, %v810_v3 }
 0x1a3   : > { %3888 = vmatpush1.bf16.msra.mxu1 %v4700_v8  ;;  %v670_v8 = vld [vmem:[%s5226_s9 + $0xb10] sm:$0xff] }
 0x1a4   : > { %3889 = vmatprep.subr.bf16.mxu1 %v4693_v10  ;;  %v798_v10 = vld [vmem:[%s5226_s9 + $0xf10] sm:$0xff]  ;;  %v4637_v17 = vcombine.high %v670_v8, %v674_v9  ;;  %v4636_v24 = vcombine.low %v670_v8, %v674_v9  ;;  %v499_v8 = vld [vmem:[%s5226_s9 + $0x5b8] sm:$0xff] }
 0x1a5   : > { %3849 = vmatpush1.bf16.msra.mxu0 %v4564_v18  ;;  %v802_v12 = vld [vmem:[%s5226_s9 + $0xf30] sm:$0xff] }
 0x1a6   : > { %3850 = vmatprep.subr.bf16.mxu0 %v4557_v20  ;;  %v4765_v18 = vcombine.high %v798_v10, %v802_v12  ;;  %v666_v20 = vld [vmem:[%s5226_s9 + $0xaf0] sm:$0xff]  ;;  %v4764_v26 = vcombine.low %v798_v10, %v802_v12 }
 0x1a7   : > { %3890 = vmatpush1.bf16.msra.mxu1 %v4692_v19  ;;  %v662_v19 = vld [vmem:[%s5226_s9 + $0xad0] sm:$0xff] }
 0x1a8   : > { %3891 = vmatprep.subr.bf16.mxu1 %v4685_v21  ;;  %v790_v21 = vld [vmem:[%s5226_s9 + $0xed0] sm:$0xff]  ;;  %v4629_v27 = vcombine.high %v662_v19, %v666_v20  ;;  %v4628_v34 = vcombine.low %v662_v19, %v666_v20  ;;  %v487_v19 = vld [vmem:[%s5226_s9 + $0x558] sm:$0xff] }
 0x1a9   : > { %3851 = vmatpush1.bf16.msra.mxu0 %v4556_v28  ;;  %v794_v23 = vld [vmem:[%s5226_s9 + $0xef0] sm:$0xff]  ;;  %v491_v20 = vld [vmem:[%s5226_s9 + $0x578] sm:$0xff] }
 0x1aa   : > { %3852 = vmatprep.subr.bf16.mxu0 %v4549_v30  ;;  %v4757_v28 = vcombine.high %v790_v21, %v794_v23  ;;  %v658_v30 = vld [vmem:[%s5226_s9 + $0xab0] sm:$0xff]  ;;  %v4756_v35 = vcombine.low %v790_v21, %v794_v23 }
 0x1ab   : > { %3892 = vmatpush1.bf16.msra.mxu1 %v4684_v29  ;;  %v654_v29 = vld [vmem:[%s5226_s9 + $0xa90] sm:$0xff] }
 0x1ac   : > { %3893 = vmatprep.subr.bf16.mxu1 %v4677_v31  ;;  %v782_v31 = vld [vmem:[%s5226_s9 + $0xe90] sm:$0xff]  ;;  %v4621_v36 = vcombine.high %v654_v29, %v658_v30  ;;  %v4620_v42 = vcombine.low %v654_v29, %v658_v30  ;;  %v4455_v29 = vcombine.high %v487_v19, %v491_v20  ;;  %v351_v30 = vld [vmem:[%s5226_s9 + $0x118] sm:$0xff] }
 0x1ad   : > { %3853 = vmatpush1.bf16.msra.mxu0 %v4548_v38  ;;  %v786_v32 = vld [vmem:[%s5226_s9 + $0xeb0] sm:$0xff] }
 0x1ae   : > { %3854 = vmatprep.subr.bf16.mxu0 %v4541_v40  ;;  %v4749_v38 = vcombine.high %v782_v31, %v786_v32  ;;  %v650_v40 = vld [vmem:[%s5226_s9 + $0xa70] sm:$0xff]  ;;  %v4748_v45 = vcombine.low %v782_v31, %v786_v32  ;;  %v355_v31 = vld [vmem:[%s5226_s9 + $0x138] sm:$0xff] }
 0x1af   : > { %3894 = vmatpush1.bf16.msra.mxu1 %v4676_v39  ;;  %v646_v39 = vld [vmem:[%s5226_s9 + $0xa50] sm:$0xff] }
 0x1b0   : > { %3895 = vmatprep.subr.bf16.mxu1 %v4669_v63  ;;  %v774_v63 = vld [vmem:[%s5226_s9 + $0xe50] sm:$0xff]  ;;  %v4613_v5 = vcombine.high %v646_v39, %v650_v40  ;;  %v4612_v52 = vcombine.low %v646_v39, %v650_v40  ;;  %v4454_v40 = vcombine.low %v487_v19, %v491_v20  ;;  %v439_v20 = vld [vmem:[%s5226_s9 + $0x3d8] sm:$0xff] }
 0x1b1   : > { %3855 = vmatpush1.bf16.msra.mxu0 %v4540_v48  ;;  %v778_v41 = vld [vmem:[%s5226_s9 + $0xe70] sm:$0xff] }
 0x1b2   : > { %3856 = vmatprep.subr.bf16.mxu0 %v4661_v4  ;;  %v4741_v48 = vcombine.high %v774_v63, %v778_v41  ;;  %v642_v4 = vld [vmem:[%s5226_s9 + $0xa30] sm:$0xff]  ;;  %v4740_v54 = vcombine.low %v774_v63, %v778_v41  ;;  %v4319_v63 = vcombine.high %v351_v30, %v355_v31 }
 0x1b3   : > { %3896 = vmatpush1.bf16.msra.mxu1 %v4668_v49  ;;  %v638_v49 = vld [vmem:[%s5226_s9 + $0xa10] sm:$0xff] }
 0x1b4   : > { %3897 = vmatprep.subr.bf16.mxu1 %v4789_v50  ;;  %v766_v50 = vld [vmem:[%s5226_s9 + $0xe10] sm:$0xff]  ;;  %v4605_v55 = vcombine.high %v638_v49, %v642_v4  ;;  %v4604_v1 = vcombine.low %v638_v49, %v642_v4 }
 0x1b5   : > { %3857 = vmatpush2.bf16.msra.mxu0 %v4660_v57  ;;  %v770_v51 = vld [vmem:[%s5226_s9 + $0xe30] sm:$0xff] }
 0x1b6   : > { %3858 = vmatprep.subr.bf16.mxu0 %v4653_v59  ;;  %v4733_v57 = vcombine.high %v766_v50, %v770_v51  ;;  %v379_v59 = vld [vmem:[%s5226_s9 + $0x1f8] sm:$0xff]  ;;  %v4732_v2 = vcombine.low %v766_v50, %v770_v51 }
 0x1b7   : > { %3898 = vmatpush2.bf16.msra.mxu1 %v4788_v14  ;;  %v375_v14 = vld [vmem:[%s5226_s9 + $0x1d8] sm:$0xff] }
 0x1b8   : > { %3899 = vmatprep.subr.bf16.mxu1 %v4781_v60  ;;  %v503_v60 = vld [vmem:[%s5226_s9 + $0x5d8] sm:$0xff]  ;;  %v4343_v3 = vcombine.high %v375_v14, %v379_v59  ;;  %v4342_v9 = vcombine.low %v375_v14, %v379_v59 }
 0x1b9   : > { %3859 = vmatpush2.bf16.msra.mxu0 %v4652_v22  ;;  %v4471_v22 = vcombine.high %v503_v60, %v507_v62  ;;  %v4470_v10 = vcombine.low %v503_v60, %v507_v62  ;;  %v335_v51 = vld [vmem:[%s5226_s9 + $0x98] sm:$0xff] }
 0x1ba   : > { %3860 = vmatprep.subr.bf16.mxu0 %v4645_v25  ;;  %v371_v25 = vld [vmem:[%s5226_s9 + $0x1b8] sm:$0xff] }
 0x1bb   : > { %3900 = vmatpush2.bf16.msra.mxu1 %v4780_v6  ;;  %v367_v6 = vld [vmem:[%s5226_s9 + $0x198] sm:$0xff] }
 0x1bc   : > { %3901 = vmatprep.subr.bf16.mxu1 %v4773_v7  ;;  %v495_v7 = vld [vmem:[%s5226_s9 + $0x598] sm:$0xff]  ;;  %v4335_v12 = vcombine.high %v367_v6, %v371_v25  ;;  %v4334_v23 = vcombine.low %v367_v6, %v371_v25 }
 0x1bd   : > { %3861 = vmatpush2.bf16.msra.mxu0 %v4644_v13  ;;  %v4463_v13 = vcombine.high %v495_v7, %v499_v8  ;;  %v327_v62 = vld [vmem:[%s5226_s9 + $0x58] sm:$0xff] }
 0x1be   : > { %3862 = vmatprep.subr.bf16.mxu0 %v4637_v17  ;;  %v363_v17 = vld [vmem:[%s5226_s9 + $0x178] sm:$0xff] }
 0x1bf   : > { %3902 = vmatpush2.bf16.msra.mxu1 %v4772_v15  ;;  %v359_v15 = vld [vmem:[%s5226_s9 + $0x158] sm:$0xff] }
 0x1c0   : > { %3903 = vmatprep.subr.bf16.mxu1 %v4765_v18 }
 0x1c1   : > { %3863 = vmatpush2.bf16.msra.mxu0 %v4636_v24 }
 0x1c2   : > { %3864 = vmatprep.subr.bf16.mxu0 %v4629_v27  ;;  %v4327_v27 = vcombine.high %v359_v15, %v363_v17 }
 0x1c3   : > { %3904 = vmatpush2.bf16.msra.mxu1 %v4764_v26  ;;  %v4462_v26 = vcombine.low %v495_v7, %v499_v8  ;;  %v319_v8 = vld [vmem:[%s5226_s9 + $0x18] sm:$0xff] }
 0x1c4   : > { %3905 = vmatprep.subr.bf16.mxu1 %v4757_v28 }
 0x1c5   : > { %3865 = vmatpush2.bf16.msra.mxu0 %v4628_v34  ;;  %v479_v34 = vld [vmem:[%s5226_s9 + $0x518] sm:$0xff] }
 0x1c6   : > { %3866 = vmatprep.subr.bf16.mxu0 %v4621_v36 }
 0x1c7   : > { %3906 = vmatpush2.bf16.msra.mxu1 %v4756_v35  ;;  %v483_v35 = vld [vmem:[%s5226_s9 + $0x538] sm:$0xff] }
 0x1c8   : > { %3907 = vmatprep.subr.bf16.mxu1 %v4749_v38  ;;  %v4326_v38 = vcombine.low %v359_v15, %v363_v17  ;;  %v4446_v49 = vcombine.low %v479_v34, %v483_v35 }
 0x1c9   : > { %3867 = vmatpush2.bf16.msra.mxu0 %v4620_v42  ;;  %v343_v42 = vld [vmem:[%s5226_s9 + $0xd8] sm:$0xff] }
 0x1ca   : > { %3868 = vmatprep.subr.bf16.mxu0 %v4613_v5  ;;  %v471_v5 = vld [vmem:[%s5226_s9 + $0x4d8] sm:$0xff] }
 0x1cb   : > { %3908 = vmatpush2.bf16.msra.mxu1 %v4748_v45  ;;  %v347_v45 = vld [vmem:[%s5226_s9 + $0xf8] sm:$0xff] }
 0x1cc   : > { %3909 = vmatprep.subr.bf16.mxu1 %v4741_v48  ;;  %v475_v48 = vld [vmem:[%s5226_s9 + $0x4f8] sm:$0xff]  ;;  %v4311_v4 = vcombine.high %v343_v42, %v347_v45 }
 0x1cd   : > { %3869 = vmatpush2.bf16.msra.mxu0 %v4612_v52  ;;  %v4439_v50 = vcombine.high %v471_v5, %v475_v48  ;;  %v339_v52 = vld [vmem:[%s5226_s9 + $0xb8] sm:$0xff]  ;;  %v4438_v14 = vcombine.low %v471_v5, %v475_v48 }
 0x1ce   : > { %3870 = vmatprep.subr.bf16.mxu0 %v4605_v55  ;;  %v467_v55 = vld [vmem:[%s5226_s9 + $0x4b8] sm:$0xff]  ;;  %v4303_v59 = vcombine.high %v335_v51, %v339_v52 }
 0x1cf   : > { %3910 = vmatpush2.bf16.msra.mxu1 %v4740_v54  ;;  %v463_v54 = vld [vmem:[%s5226_s9 + $0x498] sm:$0xff] }
 0x1d0   : > { %3911 = vmatprep.subr.bf16.mxu1 %v4733_v57  ;;  %v4310_v57 = vcombine.low %v343_v42, %v347_v45  ;;  %v4431_v60 = vcombine.high %v463_v54, %v467_v55  ;;  %v4430_v6 = vcombine.low %v463_v54, %v467_v55  ;;  %v427_v42 = vld [vmem:[%s5226_s9 + $0x378] sm:$0xff] }
 0x1d1   : > { %3871 = vmatpush2.bf16.msra.mxu0 %v4604_v1  ;;  %v331_v1 = vld [vmem:[%s5226_s9 + $0x78] sm:$0xff] }
 0x1d2   : > { %3922 = vmatprep.subr.bf16.mxu0 %v4343_v3  ;;  %v459_v3 = vld [vmem:[%s5226_s9 + $0x478] sm:$0xff]  ;;  %v4295_v25 = vcombine.high %v327_v62, %v331_v1 }
 0x1d3   : > { %3912 = vmatpush2.bf16.msra.mxu1 %v4732_v2  ;;  %v455_v2 = vld [vmem:[%s5226_s9 + $0x458] sm:$0xff] }
 0x1d4   : > { %3963 = vmatprep.subr.bf16.mxu1 %v4471_v22  ;;  %v5715_v18 = vpop.f32.mrf.mxu0  ;;  %3873 = vmatmul.mubr.bf16.vlgmr.msra.gmra.mxu0 %v5415_v58  ;;  %v4302_v22 = vcombine.low %v335_v51, %v339_v52  ;;  %v4423_v7 = vcombine.high %v455_v2, %v459_v3  ;;  %v4422_v15 = vcombine.low %v455_v2, %v459_v3  ;;  %v551_v45 = vld [vmem:[%s5226_s9 + $0x758] sm:$0xff] }
 0x1d5   : > { %3923 = vmatpush1.bf16.msra.mxu0 %v4342_v9  ;;  %3954 = vmatprep.mubr.bf16.mxu0 %v5279_v11  ;;  %v4447_v11 = vcombine.high %v479_v34, %v483_v35  ;;  %v323_v9 = vld [vmem:[%s5226_s9 + $0x38] sm:$0xff] }
 0x1d6   : > { %v5720_v21 = vpop.f32.mrf.mxu1  ;;  %3914 = vmatmul.mubr.bf16.vlgmr.msra.gmra.mxu1 %v5421_v61  ;;  %v5723_v24 = vpop.f32.mrf.mxu0  ;;  %3924 = vmatprep.subr.bf16.mxu0 %v4335_v12  ;;  %v451_v12 = vld [vmem:[%s5226_s9 + $0x438] sm:$0xff]  ;;  %v4287_v17 = vcombine.high %v319_v8, %v323_v9 }
 0x1d7   : > { %3964 = vmatpush1.bf16.msra.mxu1 %v4470_v10  ;;  %3995 = vmatprep.mubr.bf16.mxu1 %v5286_v16  ;;  %v4318_v16 = vcombine.low %v351_v30, %v355_v31  ;;  %v447_v10 = vld [vmem:[%s5226_s9 + $0x418] sm:$0xff] }
 0x1d8   : > { %v5725_v28 = vpop.f32.mrf.mxu1  ;;  %3965 = vmatprep.subr.bf16.mxu1 %v4463_v13  ;;  %v3632_v32 = vpop.f32.mrf.mxu0  ;;  %v4294_v13 = vcombine.low %v327_v62, %v331_v1  ;;  %v4415_v19 = vcombine.high %v447_v10, %v451_v12  ;;  %v4414_v30 = vcombine.low %v447_v10, %v451_v12  ;;  %v431_v34 = vld [vmem:[%s5226_s9 + $0x398] sm:$0xff] }
 0x1d9   : > { %3925 = vmatpush1.bf16.msra.mxu0 %v4334_v23  ;;  %v443_v23 = vld [vmem:[%s5226_s9 + $0x3f8] sm:$0xff] }
 0x1da   : > { %v3673_v36 = vpop.f32.mrf.mxu1  ;;  %v3633_v39 = vpop.f32.mrf.mxu0  ;;  %3926 = vmatprep.subr.bf16.mxu0 %v4327_v27  ;;  %v571_v27 = vld [vmem:[%s5226_s9 + $0x7f8] sm:$0xff]  ;;  %v4407_v31 = vcombine.high %v439_v20, %v443_v23 }
 0x1db   : > { %3966 = vmatpush1.bf16.msra.mxu1 %v4462_v26  ;;  %v567_v26 = vld [vmem:[%s5226_s9 + $0x7d8] sm:$0xff]  ;;  %v4406_v39 = vcombine.low %v439_v20, %v443_v23 }
 0x1dc   : > { %v3674_v41 = vpop.f32.mrf.mxu1  ;;  %3967 = vmatprep.subr.bf16.mxu1 %v4455_v29  ;;  %v4286_v29 = vcombine.low %v319_v8, %v323_v9  ;;  %v4535_v32 = vcombine.high %v567_v26, %v571_v27  ;;  %v435_v35 = vld [vmem:[%s5226_s9 + $0x3b8] sm:$0xff] }
 0x1dd   : > { %3927 = vmatpush1.bf16.msra.mxu0 %v4326_v38  ;;  %v559_v36 = vld [vmem:[%s5226_s9 + $0x798] sm:$0xff]  ;;  %v4398_v48 = vcombine.low %v431_v34, %v435_v35 }
 0x1de   : > { %3928 = vmatprep.subr.bf16.mxu0 %v4319_v63  ;;  %v563_v38 = vld [vmem:[%s5226_s9 + $0x7b8] sm:$0xff]  ;;  %v4399_v63 = vcombine.high %v431_v34, %v435_v35 }
 0x1df   : > { %3968 = vmatpush1.bf16.msra.mxu1 %v4454_v40  ;;  %v4534_v40 = vcombine.low %v567_v26, %v571_v27  ;;  %v4527_v41 = vcombine.high %v559_v36, %v563_v38  ;;  %v555_v5 = vld [vmem:[%s5226_s9 + $0x778] sm:$0xff] }
 0x1e0   : > { %3969 = vmatprep.subr.bf16.mxu1 %v4447_v11  ;;  %v423_v11 = vld [vmem:[%s5226_s9 + $0x358] sm:$0xff] }
 0x1e1   : > { %3929 = vmatpush1.bf16.msra.mxu0 %v4318_v16  ;;  %v4526_v16 = vcombine.low %v559_v36, %v563_v38  ;;  %v419_v51 = vld [vmem:[%s5226_s9 + $0x338] sm:$0xff]  ;;  %v4390_v55 = vcombine.low %v423_v11, %v427_v42 }
 0x1e2   : > { %3930 = vmatprep.subr.bf16.mxu0 %v4311_v4  ;;  %v4519_v4 = vcombine.high %v551_v45, %v555_v5  ;;  %v543_v52 = vld [vmem:[%s5226_s9 + $0x718] sm:$0xff] }
 0x1e3   : > { %3970 = vmatpush1.bf16.msra.mxu1 %v4446_v49  ;;  %v4391_v49 = vcombine.high %v423_v11, %v427_v42  ;;  %v547_v54 = vld [vmem:[%s5226_s9 + $0x738] sm:$0xff]  ;;  %v5784_v11 = vld [vmem:[%s5557_s23] sm:$0xff] }
 0x1e4   : > { %3971 = vmatprep.subr.bf16.mxu1 %v4439_v50  ;;  %v415_v50 = vld [vmem:[%s5226_s9 + $0x318] sm:$0xff] }
 0x1e5   : > { %3931 = vmatpush1.bf16.msra.mxu0 %v4310_v57  ;;  %v4518_v57 = vcombine.low %v551_v45, %v555_v5  ;;  %v411_v62 = vld [vmem:[%s5226_s9 + $0x2f8] sm:$0xff]  ;;  %v4382_v3 = vcombine.low %v415_v50, %v419_v51 }
 0x1e6   : > { %3932 = vmatprep.subr.bf16.mxu0 %v4303_v59  ;;  %v4511_v59 = vcombine.high %v543_v52, %v547_v54  ;;  %v535_v1 = vld [vmem:[%s5226_s9 + $0x6d8] sm:$0xff] }
 0x1e7   : > { %3972 = vmatpush1.bf16.msra.mxu1 %v4438_v14  ;;  %v4383_v14 = vcombine.high %v415_v50, %v419_v51  ;;  %v539_v2 = vld [vmem:[%s5226_s9 + $0x6f8] sm:$0xff] }
 0x1e8   : > { %3973 = vmatprep.subr.bf16.mxu1 %v4431_v60  ;;  %v407_v60 = vld [vmem:[%s5226_s9 + $0x2d8] sm:$0xff] }
 0x1e9   : > { %3933 = vmatpush1.bf16.msra.mxu0 %v4302_v22  ;;  %v4510_v22 = vcombine.low %v543_v52, %v547_v54  ;;  %v403_v8 = vld [vmem:[%s5226_s9 + $0x2b8] sm:$0xff]  ;;  %v4374_v12 = vcombine.low %v407_v60, %v411_v62 }
 0x1ea   : > { %3934 = vmatprep.subr.bf16.mxu0 %v4295_v25  ;;  %v4503_v25 = vcombine.high %v535_v1, %v539_v2  ;;  %v527_v9 = vld [vmem:[%s5226_s9 + $0x698] sm:$0xff] }
 0x1eb   : > { %3974 = vmatpush1.bf16.msra.mxu1 %v4430_v6  ;;  %v4375_v6 = vcombine.high %v407_v60, %v411_v62  ;;  %v531_v10 = vld [vmem:[%s5226_s9 + $0x6b8] sm:$0xff] }
 0x1ec   : > { %3975 = vmatprep.subr.bf16.mxu1 %v4423_v7  ;;  %v399_v7 = vld [vmem:[%s5226_s9 + $0x298] sm:$0xff] }
 0x1ed   : > { %3935 = vmatpush1.bf16.msra.mxu0 %v4294_v13  ;;  %v4502_v13 = vcombine.low %v535_v1, %v539_v2  ;;  %v395_v20 = vld [vmem:[%s5226_s9 + $0x278] sm:$0xff]  ;;  %v4366_v27 = vcombine.low %v399_v7, %v403_v8 }
 0x1ee   : > { %3936 = vmatprep.subr.bf16.mxu0 %v4287_v17  ;;  %v4495_v17 = vcombine.high %v527_v9, %v531_v10  ;;  %v519_v23 = vld [vmem:[%s5226_s9 + $0x658] sm:$0xff] }
 0x1ef   : > { %3976 = vmatpush1.bf16.msra.mxu1 %v4422_v15  ;;  %v4367_v15 = vcombine.high %v399_v7, %v403_v8  ;;  %v523_v26 = vld [vmem:[%s5226_s9 + $0x678] sm:$0xff] }
 0x1f0   : > { %3977 = vmatprep.subr.bf16.mxu1 %v4415_v19  ;;  %v391_v19 = vld [vmem:[%s5226_s9 + $0x258] sm:$0xff] }
 0x1f1   : > { %3937 = vmatpush1.bf16.msra.mxu0 %v4286_v29  ;;  %v4494_v29 = vcombine.low %v527_v9, %v531_v10  ;;  %v383_v34 = vld [vmem:[%s5226_s9 + $0x218] sm:$0xff] }
 0x1f2   : > { %3938 = vmatprep.subr.bf16.mxu0 %v4407_v31  ;;  %v840_v31 = vsub.s32 2, %v5254_v44  ;;  %v387_v35 = vld [vmem:[%s5226_s9 + $0x238] sm:$0xff] }
 0x1f3   : > { %3978 = vmatpush1.bf16.msra.mxu1 %v4414_v30  ;;  %v4359_v30 = vcombine.high %v391_v19, %v395_v20  ;;  %v511_v36 = vld [vmem:[%s5226_s9 + $0x618] sm:$0xff]  ;;  %v4350_v50 = vcombine.low %v383_v34, %v387_v35 }
 0x1f4   : > { %3979 = vmatprep.subr.bf16.mxu1 %v4535_v32  ;;  %v4487_v32 = vcombine.high %v519_v23, %v523_v26  ;;  %v515_v38 = vld [vmem:[%s5226_s9 + $0x638] sm:$0xff]  ;;  %v841_v42 = vrot.slane %v5784_v11, %v840_v31 }
 0x1f5   : > { %3939 = vmatpush2.bf16.msra.mxu0 %v4406_v39  ;;  %v844_v39 = vsub.s32 3, %v5254_v44  ;;  %v4479_v45 = vcombine.high %v511_v36, %v515_v38  ;;  %v631_v5 = vld [vmem:[%s5226_s9 + $0x9d8] sm:$0xff]  ;;  %v4478_v51 = vcombine.low %v511_v36, %v515_v38 }
 0x1f6   : > { %3940 = vmatprep.subr.bf16.mxu0 %v4399_v63  ;;  %v4486_v63 = vcombine.low %v519_v23, %v523_v26  ;;  %v3629_v54 = vadd.f32 %v5715_v18, %v841_v42  ;;  %v755_v60 = vld [vmem:[%s5226_s9 + $0xdb8] sm:$0xff]  ;;  %v4102_v42 = vrot.slane %v4094_v0, %v5261_v53 }
 0x1f7   : > { %3980 = vmatpush2.bf16.msra.mxu1 %v4534_v40  ;;  %v4358_v40 = vcombine.low %v391_v19, %v395_v20  ;;  %v743_v8 = vld [vmem:[%s5226_s9 + $0xd58] sm:$0xff] }
 0x1f8   : > { %3981 = vmatprep.subr.bf16.mxu1 %v4527_v41  ;;  %v4351_v41 = vcombine.high %v383_v34, %v387_v35  ;;  %v3670_v18 = vadd.f32 %v5720_v21, %v3629_v54  ;;  %v747_v9 = vld [vmem:[%s5226_s9 + $0xd78] sm:$0xff] }
 0x1f9   : > { %3941 = vmatpush2.bf16.msra.mxu0 %v4398_v48  ;;  %v635_v48 = vld [vmem:[%s5226_s9 + $0x9f8] sm:$0xff]  ;;  %v4711_v20 = vcombine.high %v743_v8, %v747_v9  ;;  %v4710_v35 = vcombine.low %v743_v8, %v747_v9 }
 0x1fa   : > { %3942 = vmatprep.subr.bf16.mxu0 %v4391_v49  ;;  %v763_v49 = vld [vmem:[%s5226_s9 + $0xdf8] sm:$0xff]  ;;  %v4599_v52 = vcombine.high %v631_v5, %v635_v48  ;;  %v4598_v1 = vcombine.low %v631_v5, %v635_v48 }
 0x1fb   : > { %3982 = vmatpush2.bf16.msra.mxu1 %v4526_v16  ;;  %v759_v16 = vld [vmem:[%s5226_s9 + $0xdd8] sm:$0xff] }
 0x1fc   : > { %3983 = vmatprep.subr.bf16.mxu1 %v4519_v4  ;;  %v845_v4 = vrot.slane %v5784_v11, %v844_v39  ;;  %v4726_v2 = vcombine.low %v759_v16, %v763_v49  ;;  %v607_v23 = vld [vmem:[%s5226_s9 + $0x918] sm:$0xff] }
 0x1fd   : > { %3943 = vmatpush2.bf16.msra.mxu0 %v4390_v55  ;;  %v4727_v55 = vcombine.high %v759_v16, %v763_v49 }
 0x1fe   : > { %3944 = vmatprep.subr.bf16.mxu0 %v4383_v14  ;;  %v627_v14 = vld [vmem:[%s5226_s9 + $0x9b8] sm:$0xff]  ;;  %v3631_v62 = vadd.f32 %v5723_v24, %v845_v4 }
 0x1ff   : > { %3984 = vmatpush2.bf16.msra.mxu1 %v4518_v57  ;;  %v623_v57 = vld [vmem:[%s5226_s9 + $0x998] sm:$0xff] }
 0x200   : > { %3985 = vmatprep.subr.bf16.mxu1 %v4511_v59  ;;  %v751_v59 = vld [vmem:[%s5226_s9 + $0xd98] sm:$0xff]  ;;  %v3672_v24 = vadd.f32 %v5725_v28, %v3631_v62  ;;  %v4590_v21 = vcombine.low %v623_v57, %v627_v14 }
 0x201   : > { %3945 = vmatpush2.bf16.msra.mxu0 %v4382_v3  ;;  %v4591_v3 = vcombine.high %v623_v57, %v627_v14  ;;  %v611_v28 = vld [vmem:[%s5226_s9 + $0x938] sm:$0xff] }
 0x202   : > { %3946 = vmatprep.subr.bf16.mxu0 %v4375_v6  ;;  %v615_v6 = vld [vmem:[%s5226_s9 + $0x958] sm:$0xff]  ;;  %v4574_v5 = vcombine.low %v607_v23, %v611_v28 }
 0x203   : > { %3986 = vmatpush2.bf16.msra.mxu1 %v4510_v22  ;;  %v4719_v22 = vcombine.high %v751_v59, %v755_v60  ;;  %v583_v57 = vld [vmem:[%s5226_s9 + $0x858] sm:$0xff] }
 0x204   : > { %3987 = vmatprep.subr.bf16.mxu1 %v4503_v25  ;;  %v619_v25 = vld [vmem:[%s5226_s9 + $0x978] sm:$0xff] }
 0x205   : > { %3947 = vmatpush2.bf16.msra.mxu0 %v4374_v12  ;;  %v587_v14 = vld [vmem:[%s5226_s9 + $0x878] sm:$0xff] }
 0x206   : > { %3948 = vmatprep.subr.bf16.mxu0 %v4367_v15  ;;  %v4718_v15 = vcombine.low %v751_v59, %v755_v60  ;;  %v711_v59 = vld [vmem:[%s5226_s9 + $0xc58] sm:$0xff] }
 0x207   : > { %3988 = vmatpush2.bf16.msra.mxu1 %v4502_v13  ;;  %v715_v60 = vld [vmem:[%s5226_s9 + $0xc78] sm:$0xff] }
 0x208   : > { %3989 = vmatprep.subr.bf16.mxu1 %v4495_v17  ;;  %v4583_v17 = vcombine.high %v615_v6, %v619_v25  ;;  %v4678_v8 = vcombine.low %v711_v59, %v715_v60 }
 0x209   : > { %3949 = vmatpush2.bf16.msra.mxu0 %v4366_v27  ;;  %v735_v27 = vld [vmem:[%s5226_s9 + $0xd18] sm:$0xff] }
 0x20a   : > { %3950 = vmatprep.subr.bf16.mxu0 %v4359_v30 }
 0x20b   : > { %3990 = vmatpush2.bf16.msra.mxu1 %v4494_v29 }
 0x20c   : > { %3991 = vmatprep.subr.bf16.mxu1 %v4487_v32  ;;  %v4582_v32 = vcombine.low %v615_v6, %v619_v25  ;;  %v703_v6 = vld [vmem:[%s5226_s9 + $0xc18] sm:$0xff] }
 0x20d   : > { %3951 = vmatpush2.bf16.msra.mxu0 %v4358_v40  ;;  %v599_v40 = vld [vmem:[%s5226_s9 + $0x8d8] sm:$0xff] }
 0x20e   : > { %3952 = vmatprep.subr.bf16.mxu0 %v4351_v41  ;;  %v731_v41 = vld [vmem:[%s5226_s9 + $0xcf8] sm:$0xff] }
 0x20f   : > { %3992 = vmatpush2.bf16.msra.mxu1 %v4486_v63  ;;  %v727_v63 = vld [vmem:[%s5226_s9 + $0xcd8] sm:$0xff] }
 0x210   : > { %3993 = vmatprep.subr.bf16.mxu1 %v4479_v45  ;;  %v4695_v4 = vcombine.high %v727_v63, %v731_v41  ;;  %v4694_v0 = vcombine.low %v727_v63, %v731_v41  ;;  %v707_v25 = vld [vmem:[%s5226_s9 + $0xc38] sm:$0xff] }
 0x211   : > { %3953 = vmatpush2.bf16.msra.mxu0 %v4350_v50  ;;  %v591_v50 = vld [vmem:[%s5226_s9 + $0x898] sm:$0xff] }
 0x212   : > { %4004 = vmatprep.subr.bf16.mxu0 %v4599_v52  ;;  %v719_v52 = vld [vmem:[%s5226_s9 + $0xc98] sm:$0xff] }
 0x213   : > { %3994 = vmatpush2.bf16.msra.mxu1 %v4478_v51  ;;  %v595_v51 = vld [vmem:[%s5226_s9 + $0x8b8] sm:$0xff] }
 0x214   : > { %4045 = vmatprep.subr.bf16.mxu1 %v4727_v55  ;;  %v3710_v7 = vpop.f32.mrf.mxu0  ;;  %3955 = vmatmul.mubr.bf16.vlgmr.msra.gmra.mxu0 %v5333_v33  ;;  %v4559_v54 = vcombine.high %v591_v50, %v595_v51  ;;  %v4687_v55 = vcombine.high %v719_v52, %v723_v47  ;;  %v4558_v62 = vcombine.low %v591_v50, %v595_v51  ;;  %v799_v63 = vld [vmem:[%s5226_s9 + $0xf18] sm:$0xff] }
 0x215   : > { %v3711_v10 = vadd.f32 %v3710_v7, %v3670_v18  ;;  %4005 = vmatpush1.bf16.msra.mxu0 %v4598_v1  ;;  %4036 = vmatprep.mubr.bf16.mxu0 %v5345_v43  ;;  %v4575_v43 = vcombine.high %v607_v23, %v611_v28  ;;  %v4686_v1 = vcombine.low %v719_v52, %v723_v47  ;;  %v575_v18 = vld [vmem:[%s5226_s9 + $0x818] sm:$0xff] }
 0x216   : > { %v3751_v12 = vpop.f32.mrf.mxu1  ;;  %3996 = vmatmul.mubr.bf16.vlgmr.msra.gmra.mxu1 %v5341_v37  ;;  %v3712_v13 = vpop.f32.mrf.mxu0  ;;  %4006 = vmatprep.subr.bf16.mxu0 %v4591_v3  ;;  %v739_v37 = vld [vmem:[%s5226_s9 + $0xd38] sm:$0xff]  ;;  %v4679_v3 = vcombine.high %v711_v59, %v715_v60  ;;  %v4550_v7 = vcombine.low %v583_v57, %v587_v14 }
 0x217   : > { %4046 = vmatpush1.bf16.msra.mxu1 %v4726_v2  ;;  %v3713_v33 = vadd.f32 %v3712_v13, %v3672_v24  ;;  %4077 = vmatprep.mubr.bf16.mxu1 %v5350_v46  ;;  %v3752_v29 = vadd.f32 %v3751_v12, %v3711_v10  ;;  %v4703_v39 = vcombine.high %v735_v27, %v739_v37  ;;  %v603_v46 = vld [vmem:[%s5226_s9 + $0x8f8] sm:$0xff] }
 0x218   : > { %v3753_v19 = vpop.f32.mrf.mxu1  ;;  %4047 = vmatprep.subr.bf16.mxu1 %v4719_v22  ;;  %v3714_v26 = vpop.f32.mrf.mxu0  ;;  %v4702_v48 = vcombine.low %v735_v27, %v739_v37  ;;  %v4567_v16 = vcombine.high %v599_v40, %v603_v46  ;;  %v4566_v56 = vcombine.low %v599_v40, %v603_v46  ;;  %v4551_v2 = vcombine.high %v583_v57, %v587_v14  ;;  %v579_v22 = vld [vmem:[%s5226_s9 + $0x838] sm:$0xff] }
 0x219   : > { %v3754_v30 = vadd.f32 %v3753_v19, %v3713_v33  ;;  %4007 = vmatpush1.bf16.msra.mxu0 %v4590_v21  ;;  %v4543_v9 = vcombine.high %v575_v18, %v579_v22  ;;  %v4671_v24 = vcombine.high %v703_v6, %v707_v25  ;;  %v695_v10 = vld [vmem:[%s5226_s9 + $0xbd8] sm:$0xff] }
 0x21a   : > { %v3755_v31 = vpop.f32.mrf.mxu1  ;;  %v3715_v34 = vpop.f32.mrf.mxu0  ;;  %4008 = vmatprep.subr.bf16.mxu0 %v4583_v17  ;;  %v699_v12 = vld [vmem:[%s5226_s9 + $0xbf8] sm:$0xff]  ;;  %v4670_v17 = vcombine.low %v703_v6, %v707_v25 }
 0x21b   : > { %4048 = vmatpush1.bf16.msra.mxu1 %v4718_v15  ;;  %v4095_v36 = vcombine.low %v3752_v29, %v3754_v30  ;;  %v823_v21 = vld [vmem:[%s5226_s9 + $0xfd8] sm:$0xff]  ;;  %v4542_v15 = vcombine.low %v575_v18, %v579_v22  ;;  %v4663_v33 = vcombine.high %v695_v10, %v699_v12  ;;  %v4662_v27 = vcombine.low %v695_v10, %v699_v12 }
 0x21c   : > { %v3756_v38 = vpop.f32.mrf.mxu1  ;;  %4049 = vmatprep.subr.bf16.mxu1 %v4711_v20  ;;  %v827_v13 = vld [vmem:[%s5226_s9 + $0xff8] sm:$0xff] }
 0x21d   : > { %v4109_v45 = vrot.slane %v4095_v36, %v5261_v53  ;;  %4009 = vmatpush1.bf16.msra.mxu0 %v4582_v32  ;;  %v4791_v19 = vcombine.high %v823_v21, %v827_v13  ;;  %v687_v20 = vld [vmem:[%s5226_s9 + $0xb98] sm:$0xff]  ;;  %v4790_v37 = vcombine.low %v823_v21, %v827_v13 }
 0x21e   : > { %4010 = vmatprep.subr.bf16.mxu0 %v4575_v43  ;;  %v691_v23 = vld [vmem:[%s5226_s9 + $0xbb8] sm:$0xff] }
 0x21f   : > { %4050 = vmatpush1.bf16.msra.mxu1 %v4710_v35  ;;  %v4110_v49 = vcombine.low %v4102_v42, %v4109_v45  ;;  %v815_v28 = vld [vmem:[%s5226_s9 + $0xf98] sm:$0xff]  ;;  %v4655_v29 = vcombine.high %v687_v20, %v691_v23  ;;  %v4654_v43 = vcombine.low %v687_v20, %v691_v23  ;;  %v852_v20 = vsub.s32 5, %v5254_v44 }
 0x220   : > { %4051 = vmatprep.subr.bf16.mxu1 %v4703_v39  ;;  %v819_v26 = vld [vmem:[%s5226_s9 + $0xfb8] sm:$0xff] }
 0x221   : > { %4011 = vmatpush1.bf16.msra.mxu0 %v4574_v5  ;;  %4130 = vst [vmem:[%s5826_s4] sm:$0xff] %v4110_v49  ;;  %v4783_v30 = vcombine.high %v815_v28, %v819_v26  ;;  %v679_v31 = vld [vmem:[%s5226_s9 + $0xb58] sm:$0xff]  ;;  %v4782_v36 = vcombine.low %v815_v28, %v819_v26  ;;  %v853_v28 = vrot.slane %v5784_v11, %v852_v20 }
 0x222   : > { %4012 = vmatprep.subr.bf16.mxu0 %v4567_v16  ;;  %v683_v32 = vld [vmem:[%s5226_s9 + $0xb78] sm:$0xff] }
 0x223   : > { %4052 = vmatpush1.bf16.msra.mxu1 %v4702_v48  ;;  %v807_v34 = vld [vmem:[%s5226_s9 + $0xf58] sm:$0xff]  ;;  %v4647_v38 = vcombine.high %v679_v31, %v683_v32  ;;  %v4646_v42 = vcombine.low %v679_v31, %v683_v32 }
 0x224   : > { %4053 = vmatprep.subr.bf16.mxu1 %v4695_v4  ;;  %v811_v35 = vld [vmem:[%s5226_s9 + $0xf78] sm:$0xff] }
 0x225   : > { %4013 = vmatpush1.bf16.msra.mxu0 %v4566_v56  ;;  %v4775_v39 = vcombine.high %v807_v34, %v811_v35  ;;  %v671_v40 = vld [vmem:[%s5226_s9 + $0xb18] sm:$0xff]  ;;  %v4774_v45 = vcombine.low %v807_v34, %v811_v35 }
 0x226   : > { %4014 = vmatprep.subr.bf16.mxu0 %v4559_v54  ;;  %v675_v46 = vld [vmem:[%s5226_s9 + $0xb38] sm:$0xff] }
 0x227   : > { %4054 = vmatpush1.bf16.msra.mxu1 %v4694_v0  ;;  %v803_v41 = vld [vmem:[%s5226_s9 + $0xf38] sm:$0xff]  ;;  %v4639_v5 = vcombine.high %v671_v40, %v675_v46  ;;  %v4638_v51 = vcombine.low %v671_v40, %v675_v46 }
 0x228   : > { %4055 = vmatprep.subr.bf16.mxu1 %v4687_v55  ;;  %v4767_v48 = vcombine.high %v799_v63, %v803_v41  ;;  %v663_v16 = vld [vmem:[%s5226_s9 + $0xad8] sm:$0xff]  ;;  %v4766_v52 = vcombine.low %v799_v63, %v803_v41 }
 0x229   : > { %4015 = vmatpush1.bf16.msra.mxu0 %v4558_v62  ;;  %v667_v49 = vld [vmem:[%s5226_s9 + $0xaf8] sm:$0xff] }
 0x22a   : > { %4016 = vmatprep.subr.bf16.mxu0 %v4551_v2  ;;  %v791_v4 = vld [vmem:[%s5226_s9 + $0xed8] sm:$0xff]  ;;  %v4631_v47 = vcombine.high %v663_v16, %v667_v49  ;;  %v4630_v14 = vcombine.low %v663_v16, %v667_v49 }
 0x22b   : > { %4056 = vmatpush1.bf16.msra.mxu1 %v4686_v1  ;;  %v795_v50 = vld [vmem:[%s5226_s9 + $0xef8] sm:$0xff] }
 0x22c   : > { %4057 = vmatprep.subr.bf16.mxu1 %v4679_v3  ;;  %v4759_v56 = vcombine.high %v791_v4, %v795_v50  ;;  %v655_v0 = vld [vmem:[%s5226_s9 + $0xa98] sm:$0xff]  ;;  %v4758_v59 = vcombine.low %v791_v4, %v795_v50 }
 0x22d   : > { %4017 = vmatpush1.bf16.msra.mxu0 %v4550_v7  ;;  %v659_v54 = vld [vmem:[%s5226_s9 + $0xab8] sm:$0xff] }
 0x22e   : > { %4018 = vmatprep.subr.bf16.mxu0 %v4543_v9  ;;  %v783_v55 = vld [vmem:[%s5226_s9 + $0xe98] sm:$0xff]  ;;  %v4623_v60 = vcombine.high %v655_v0, %v659_v54  ;;  %v4622_v22 = vcombine.low %v655_v0, %v659_v54 }
 0x22f   : > { %4058 = vmatpush1.bf16.msra.mxu1 %v4678_v8  ;;  %v787_v57 = vld [vmem:[%s5226_s9 + $0xeb8] sm:$0xff] }
 0x230   : > { %4059 = vmatprep.subr.bf16.mxu1 %v4671_v24  ;;  %v4751_v62 = vcombine.high %v783_v55, %v787_v57  ;;  %v647_v1 = vld [vmem:[%s5226_s9 + $0xa58] sm:$0xff]  ;;  %v4750_v6 = vcombine.low %v783_v55, %v787_v57  ;;  %v856_v55 = vsub.s32 6, %v5254_v44  ;;  %v860_v57 = vsub.s32 7, %v5254_v44 }
 0x231   : > { %4019 = vmatpush1.bf16.msra.mxu0 %v4542_v15  ;;  %v651_v2 = vld [vmem:[%s5226_s9 + $0xa78] sm:$0xff] }
 0x232   : > { %4020 = vmatprep.subr.bf16.mxu0 %v4663_v33  ;;  %v775_v3 = vld [vmem:[%s5226_s9 + $0xe58] sm:$0xff]  ;;  %v4615_v25 = vcombine.high %v647_v1, %v651_v2  ;;  %v4614_v12 = vcombine.low %v647_v1, %v651_v2  ;;  %v848_v33 = vsub.s32 4, %v5254_v44 }
 0x233   : > { %4060 = vmatpush1.bf16.msra.mxu1 %v4670_v17  ;;  %v779_v18 = vld [vmem:[%s5226_s9 + $0xe78] sm:$0xff] }
 0x234   : > { %4061 = vmatprep.subr.bf16.mxu1 %v4791_v19  ;;  %v4743_v7 = vcombine.high %v775_v3, %v779_v18  ;;  %v639_v8 = vld [vmem:[%s5226_s9 + $0xa18] sm:$0xff]  ;;  %v4742_v21 = vcombine.low %v775_v3, %v779_v18  ;;  %v849_v23 = vrot.slane %v5784_v11, %v848_v33 }
 0x235   : > { %4021 = vmatpush2.bf16.msra.mxu0 %v4662_v27  ;;  %v643_v9 = vld [vmem:[%s5226_s9 + $0xa38] sm:$0xff] }
 0x236   : > { %4022 = vmatprep.subr.bf16.mxu0 %v4655_v29  ;;  %v767_v24 = vld [vmem:[%s5226_s9 + $0xe18] sm:$0xff]  ;;  %v4607_v13 = vcombine.high %v639_v8, %v643_v9  ;;  %v4606_v17 = vcombine.low %v639_v8, %v643_v9 }
 0x237   : > { %4062 = vmatpush2.bf16.msra.mxu1 %v4790_v37  ;;  %v771_v10 = vld [vmem:[%s5226_s9 + $0xe38] sm:$0xff] }
 0x238   : > { %4063 = vmatprep.subr.bf16.mxu1 %v4783_v30  ;;  %v4735_v15 = vcombine.high %v767_v24, %v771_v10  ;;  %v4734_v19 = vcombine.low %v767_v24, %v771_v10 }
 0x239   : > { %4023 = vmatpush2.bf16.msra.mxu0 %v4654_v43 }
 0x23a   : > { %4024 = vmatprep.subr.bf16.mxu0 %v4647_v38 }
 0x23b   : > { %4064 = vmatpush2.bf16.msra.mxu1 %v4782_v36 }
 0x23c   : > { %4065 = vmatprep.subr.bf16.mxu1 %v4775_v39 }
 0x23d   : > { %4025 = vmatpush2.bf16.msra.mxu0 %v4646_v42 }
 0x23e   : > { %4026 = vmatprep.subr.bf16.mxu0 %v4639_v5 }
 0x23f   : > { %4066 = vmatpush2.bf16.msra.mxu1 %v4774_v45 }
 0x240   : > { %4067 = vmatprep.subr.bf16.mxu1 %v4767_v48 }
 0x241   : > { %4027 = vmatpush2.bf16.msra.mxu0 %v4638_v51 }
 0x242   : > { %4028 = vmatprep.subr.bf16.mxu0 %v4631_v47 }
 0x243   : > { %4068 = vmatpush2.bf16.msra.mxu1 %v4766_v52 }
 0x244   : > { %4069 = vmatprep.subr.bf16.mxu1 %v4759_v56 }
 0x245   : > { %4029 = vmatpush2.bf16.msra.mxu0 %v4630_v14  ;;  %v857_v14 = vrot.slane %v5784_v11, %v856_v55 }
 0x246   : > { %4030 = vmatprep.subr.bf16.mxu0 %v4623_v60 }
 0x247   : > { %4070 = vmatpush2.bf16.msra.mxu1 %v4758_v59  ;;  %v861_v59 = vrot.slane %v5784_v11, %v860_v57 }
 0x248   : > { %4071 = vmatprep.subr.bf16.mxu1 %v4751_v62 }
 0x249   : > { %4031 = vmatpush2.bf16.msra.mxu0 %v4622_v22 }
 0x24a   : > { %4032 = vmatprep.subr.bf16.mxu0 %v4615_v25 }
 0x24b   : > { %4072 = vmatpush2.bf16.msra.mxu1 %v4750_v6 }
 0x24c   : > { %4073 = vmatprep.subr.bf16.mxu1 %v4743_v7 }
 0x24d   : > { %4033 = vmatpush2.bf16.msra.mxu0 %v4614_v12 }
 0x24e   : > { %4034 = vmatprep.subr.bf16.mxu0 %v4607_v13 }
 0x24f   : > { %4074 = vmatpush2.bf16.msra.mxu1 %v4742_v21 }
 0x250   : > { %4075 = vmatprep.subr.bf16.mxu1 %v4735_v15 }
 0x251   : > { %4035 = vmatpush2.bf16.msra.mxu0 %v4606_v17 }
 0x253   : > { %4076 = vmatpush2.bf16.msra.mxu1 %v4734_v19 }
 0x254   : > { %v3792_v26 = vpop.f32.mrf.mxu0  ;;  %4037 = vmatmul.mubr.bf16.vlgmr.msra.gmra.mxu0 %v5415_v58 }
 0x255   : > { %v3793_v27 = vadd.f32 %v3792_v26, %v849_v23 }
 0x256   : > { %v3833_v37 = vpop.f32.mrf.mxu1  ;;  %4078 = vmatmul.mubr.bf16.vlgmr.msra.gmra.mxu1 %v5421_v61  ;;  %v3794_v29 = vpop.f32.mrf.mxu0 }
 0x257   : > { %v3834_v30 = vadd.f32 %v3833_v37, %v3793_v27  ;;  %v3795_v31 = vadd.f32 %v3794_v29, %v853_v28 }
 0x258   : > { %v3835_v32 = vpop.f32.mrf.mxu1  ;;  %v3796_v34 = vpop.f32.mrf.mxu0 }
 0x259   : > { %v3836_v35 = vadd.f32 %v3835_v32, %v3795_v31 }
 0x25a   : > { %v3837_v43 = vpop.f32.mrf.mxu1  ;;  %v3797_v36 = vpop.f32.mrf.mxu0 }
 0x25c   : > { %v3838_v38 = vpop.f32.mrf.mxu1 }
 0x294   : > { %v3874_v39 = vpop.f32.mrf.mxu0 }
 0x295   : > { %v3875_v40 = vadd.f32 %v3874_v39, %v3834_v30 }
 0x296   : > { %v3915_v46 = vpop.f32.mrf.mxu1  ;;  %v3876_v63 = vpop.f32.mrf.mxu0 }
 0x297   : > { %v3916_v41 = vadd.f32 %v3915_v46, %v3875_v40  ;;  %v3877_v42 = vadd.f32 %v3876_v63, %v3836_v35 }
 0x298   : > { %v3917_v58 = vpop.f32.mrf.mxu1  ;;  %v3878_v45 = vpop.f32.mrf.mxu0 }
 0x299   : > { %v3918_v5 = vadd.f32 %v3917_v58, %v3877_v42 }
 0x29a   : > { %v3919_v48 = vpop.f32.mrf.mxu1  ;;  %v3879_v61 = vpop.f32.mrf.mxu0 }
 0x29b   : > { %v4111_v16 = vcombine.low %v3916_v41, %v3918_v5 }
 0x29c   : > { %v3920_v49 = vpop.f32.mrf.mxu1 }
 0x29d   : > { %v4119_v21 = vrot.slane %v4111_v16, %v5261_v53 }
 0x2d4   : > { %v3956_v4 = vpop.f32.mrf.mxu0 }
 0x2d5   : > { %v3957_v60 = vadd.f32 %v3956_v4, %v857_v14 }
 0x2d6   : > { %v3997_v50 = vpop.f32.mrf.mxu1  ;;  %v3958_v51 = vpop.f32.mrf.mxu0 }
 0x2d7   : > { %v3959_v62 = vadd.f32 %v3958_v51, %v861_v59  ;;  %v3998_v1 = vadd.f32 %v3997_v50, %v3957_v60 }
 0x2d8   : > { %v3999_v52 = vpop.f32.mrf.mxu1  ;;  %v3960_v47 = vpop.f32.mrf.mxu0 }
 0x2d9   : > { %v4000_v3 = vadd.f32 %v3999_v52, %v3959_v62 }
 0x2da   : > { %v4001_v56 = vpop.f32.mrf.mxu1  ;;  %v3961_v0 = vpop.f32.mrf.mxu0 }
 0x2dc   : > { %v4002_v54 = vpop.f32.mrf.mxu1 }
 0x314   : > { %v4038_v2 = vpop.f32.mrf.mxu0 }
 0x315   : > { %v4039_v18 = vadd.f32 %v4038_v2, %v3998_v1 }
 0x316   : > { %v4079_v22 = vpop.f32.mrf.mxu1  ;;  %v4040_v6 = vpop.f32.mrf.mxu0 }
 0x317   : > { %v4041_v25 = vadd.f32 %v4040_v6, %v4000_v3  ;;  %v4080_v44 = vadd.f32 %v4079_v22, %v4039_v18 }
 0x318   : > { %v4081_v7 = vpop.f32.mrf.mxu1  ;;  %v4042_v8 = vpop.f32.mrf.mxu0 }
 0x319   : > { %v4082_v9 = vadd.f32 %v4081_v7, %v4041_v25 }
 0x31a   : > { %v4083_v24 = vpop.f32.mrf.mxu1  ;;  %v4043_v11 = vpop.f32.mrf.mxu0 }
 0x31b   : > { %v4112_v10 = vcombine.low %v4080_v44, %v4082_v9 }
 0x31c   : > { %v4084_v12 = vpop.f32.mrf.mxu1 }
 0x31d   : > { %v4126_v13 = vrot.slane %v4112_v10, %v5261_v53 }
 0x31f   : > { %v4127_v15 = vcombine.low %v4119_v21, %v4126_v13 }
 0x321   : > { %4131 = vst [vmem:[%s5826_s4 + $0x8] sm:$0xff] %v4127_v15 }
 0x322   : > { %4980 = shalt.err (!%p4977_p6)
}
 0x323   : > { %s4981_s5 = scalar_lea.hbm %s4147_s21, 256  ;;  %s4985_s8 = scalar_lea.hbm %s5926_s3, 512 }
 0x324   : > { %p4982_p9 = scmp.ne.s32.totalorder %s4147_s21, %s4981_s5  ;;  %p4986_p7 = scmp.lt.s32.totalorder %s4147_s21, %s5926_s3 }
 0x325   : > { %p4987_p12 = scmp.lt.s32.totalorder %s4985_s8, %s4981_s5 }
 0x326   : > { %p4983_p3 = pnand %p4982_p9, %p5941_p2 }
 0x327   : > { %p4988_p5 = por %p4987_p12, %p4986_p7 }
 0x328   : > { %p4984_p13 = pneg %p4983_p3 }
 0x32a   : > { %p4989_p10 = pnand %p4988_p5, %p4984_p13 }
 0x32c   : > { %4992 = shalt.err (!%p4989_p10)
}
 0x32d   : > { %4808 = dma.vmem_to_hbm [thread:$0]  (%p5941_p2), %s4150_s11, 256, %s4147_s21, %s4133_s30  }
 0x32e PF: > { %s4161_s23 = sand.u32 1, %s5031_s12   ;;  %p5942_p4 = scmp.ne.s32.totalorder %s5935_s26, 0 }
 0x32f   : > { %p5943_p11 = scmp.ge.s32.totalorder %s5051_s17, 2  ;;  %s4162_s28 = scalar_lea.sflag [#allocation4], %s4161_s23 }
 0x331   : > { %p4822_p0 = pnand %p5943_p11, %p5942_p4 }
 0x333   : > { %p4823_p8 = pneg %p4822_p0 }
 0x335   : > { %5026 = dma.done.wait (%p4823_p8), %s4162_s28, 256  }
 0x336   : > { %5028 = vsyncadd (%p4823_p8), %s4162_s28, 4294967040  ;;  %s20_s17 = sadd.s32 1, %s5051_s17   ;;  %s5944_s12 = smov %s5035_s13 }
 0x337   : > { %p17_p1 = scmp.ge.s32.totalorder %s20_s17, 4   ;;  %s5945_s13 = smov %s5039_s14 }
 0x338   : > { %s5946_s14 = smov %s5129_s24  ;;  %s5947_s15 = smov %s5047_s16 }
 0x339   : > { %s5948_s16 = smov %s5950_s18  ;;  %19 = sbr.rel (!%p17_p1) target bundleno = 9 (0x9), region = 94 }
 0x33e   :  { %4167 = vsyncpa [#allocation3], 1 }
 0x33f   :  { %4169 = vsyncpa [#allocation3 + $0x1], 1 }
 0x340   :  { %4170 = vsyncpa [#allocation6], 1 }
 0x341   :  { %4172 = vsyncpa [#allocation6 + $0x1], 1 }
 0x342   :  { %4173 = vsyncpa [#allocation4], 1 }
 0x343   :  { %4175 = vsyncpa [#allocation4 + $0x1], 1 }

</bundles_post_ra>
